<compile_context>
chip_gen: v7x
topology: tpu7x:2x2x1
jax: 0.10.0
libtpu: 0.0.40
codegen_flags: <defaults>
</compile_context>

<pallas_src>
import jax
import jax.numpy as jnp
from jax.experimental import pallas as pl
from jax.experimental.pallas import tpu as pltpu

HP = 16        # hidden width padded to a sublane multiple; lane HP-1 = constant-1 bias unit
NPAD = 128     # lane-dense action axis (real actions live in the first A lanes)
NEG_BIG = -1e30  # padded-lane logit bias; exp underflows to exactly 0 in f32


def net_kernel(x_ref, w1_ref, b1_ref, w2_ref, o_ref):
    # x_ref : (TB, F)       batch tile of states
    # w1_ref: (F, HP)       fc1 weights, zero-padded hidden columns (bias-unit col = 0)
    # b1_ref: (1, HP)       fc1 bias (real units), 0 for pad units, 1.0 for the bias unit
    # w2_ref: (HP, NPAD)    out weights; bias-unit row = b2 on real lanes, -1e30 on pads
    # o_ref : (TB, NPAD)    lane-dense probabilities (padded lanes are exactly 0)

    # fc1 + ReLU (MXU dot, f32 accumulate). The broadcast-add makes hidden lane
    # HP-1 a constant 1.0 feature that carries b2 through the second dot.
    h = jnp.dot(x_ref[...], w1_ref[...], preferred_element_type=jnp.float32) + b1_ref[...]
    h = jnp.maximum(h, 0.0)

    # out layer: single un-sliced dot; padded lanes pick up -1e30 from the bias unit.
    logits = jnp.dot(h, w2_ref[...], preferred_element_type=jnp.float32)

    # numerically-stable softmax over the (padded) action axis; exact normalization.
    m = jnp.max(logits, axis=-1, keepdims=True)
    e = jnp.exp(logits - m)
    denom = jnp.sum(e, axis=-1, keepdims=True)
    o_ref[...] = (e / denom).astype(o_ref.dtype)


def prepare_params(w1, b1, w2, b2):
    """Build the augmented / padded parameter tensors ONCE (outside the per-step
    hot path). Returns (w1p, b1p, w2p) consumed by net_forward."""
    F, H = w1.shape
    A = w2.shape[1]
    assert H < HP and A <= NPAD

    w1p = jnp.zeros((F, HP), jnp.float32).at[:, :H].set(w1.astype(jnp.float32))

    b1p = jnp.zeros((1, HP), jnp.float32).at[:, :H].set(b1.reshape(1, H).astype(jnp.float32))
    b1p = b1p.at[:, HP - 1].set(1.0)          # constant-1 "bias unit": ReLU(0*x + 1) = 1

    w2p = jnp.zeros((HP, NPAD), jnp.float32).at[:H, :A].set(w2.astype(jnp.float32))
    w2p = w2p.at[HP - 1, :].set(NEG_BIG)      # padded action lanes -> logit -1e30 -> prob 0
    w2p = w2p.at[HP - 1, :A].set(b2.reshape(A).astype(jnp.float32))  # real lanes -> + b2
    return w1p, b1p, w2p


def net_forward(x, w1p, b1p, w2p, *, n_actions, max_tile=2048):
    """x: [B, n_features] f32 -> action probabilities [B, n_actions] f32.
    (w1p, b1p, w2p) come from prepare_params and are reused across calls.)"""
    B, F = x.shape
    Hp = w1p.shape[1]
    Np = w2p.shape[1]

    if B <= max_tile:
        # Single grid step, no batch padding (the common episode-buffer case).
        tb, Bp, xp = B, B, x
    else:
        # Large buffers: tile at max_tile rows; grid >= 2 shards across v7x's 2 TCs.
        tb = max_tile
        Bp = pl.cdiv(B, tb) * tb
        xp = x if Bp == B else jnp.pad(x, ((0, Bp - B), (0, 0)))

    out = pl.pallas_call(
        net_kernel,
        out_shape=jax.ShapeDtypeStruct((Bp, Np), jnp.float32),
        grid=(Bp // tb,),
        in_specs=[
            pl.BlockSpec((tb, F), lambda i: (i, 0)),     # batch tile of states
            pl.BlockSpec((F, Hp), lambda i: (0, 0)),     # resident weights
            pl.BlockSpec((1, Hp), lambda i: (0, 0)),     # resident bias row
            pl.BlockSpec((Hp, Np), lambda i: (0, 0)),    # resident weights
        ],
        out_specs=pl.BlockSpec((tb, Np), lambda i: (i, 0)),
        compiler_params=pltpu.CompilerParams(
            dimension_semantics=("parallel",),           # megacore sharding when grid >= 2
            vmem_limit_bytes=32 * 1024 * 1024,           # far above actual footprint
        ),
    )(xp, w1p, b1p, w2p)

    # Module-exact output shape. Consumers that can read the padded (Bp, 128)
    # buffer directly (padded lanes are exactly 0) can skip this slice, or fuse
    # Gumbel-argmax sampling into the kernel to avoid the wide writeback entirely.
    return out[:B, :n_actions]


def net_reference(x, w1, b1, w2, b2):
    """Pure-JAX reference matching the PyTorch module's forward."""
    h = jnp.maximum(x @ w1 + b1.reshape(1, -1), 0.0)
    logits = h @ w2 + b2.reshape(1, -1)
    return jax.nn.softmax(logits, axis=-1)


def init_params(key, n_features, n_actions, hidden=10):
    """Weights ~ N(0, 0.1) as in the module; biases follow PyTorch Linear's
    default U(-1/sqrt(fan_in), 1/sqrt(fan_in))."""
    k1, k2, k3, k4 = jax.random.split(key, 4)
    w1 = 0.1 * jax.random.normal(k1, (n_features, hidden), dtype=jnp.float32)
    w2 = 0.1 * jax.random.normal(k2, (hidden, n_actions), dtype=jnp.float32)
    b1_bound = 1.0 / jnp.sqrt(float(n_features))
    b2_bound = 1.0 / jnp.sqrt(float(hidden))
    b1 = jax.random.uniform(k3, (1, hidden), jnp.float32, -b1_bound, b1_bound)
    b2 = jax.random.uniform(k4, (1, n_actions), jnp.float32, -b2_bound, b2_bound)
    return w1, b1, w2, b2


if __name__ == "__main__":
    # Maze PG agent shapes: n_features=4 (state), n_actions=4 (u/d/l/r).
    # Batch = one buffered episode's worth of states (amortizes the fixed
    # pallas_call / DMA overhead; single grid step at this size).
    B, n_features, n_actions = 512, 4, 4

    key = jax.random.PRNGKey(0)
    kx, kp = jax.random.split(key)
    x = jax.random.normal(kx, (B, n_features), dtype=jnp.float32)
    w1, b1, w2, b2 = init_params(kp, n_features, n_actions)

    # Augmented weights are built ONCE (hot path only runs the pallas_call).
    w1p, b1p, w2p = prepare_params(w1, b1, w2, b2)

    probs = net_forward(x, w1p, b1p, w2p, n_actions=n_actions)
    probs = jax.block_until_ready(probs)

    # sanity: shape, finiteness, exact-ish normalization, and agreement with the
    # pure-JAX reference forward.
    assert probs.shape == (B, n_actions)
    assert bool(jnp.all(jnp.isfinite(probs)))
    assert bool(jnp.allclose(jnp.sum(probs, axis=-1), 1.0, atol=1e-3))
    ref = net_reference(x, w1, b1, w2, b2)
    assert bool(jnp.allclose(probs, ref, atol=2e-3, rtol=2e-3))

    print("KERNEL_OK")
</pallas_src>

<mosaic_0001>
module attributes {stable_mosaic.version = 11 : i64} {
  func.func @net_kernel(%arg0: i32, %arg1: memref<512x4xf32, #tpu.memory_space<vmem>>, %arg2: memref<4x16xf32, #tpu.memory_space<vmem>>, %arg3: memref<1x16xf32, #tpu.memory_space<vmem>>, %arg4: memref<16x128xf32, #tpu.memory_space<vmem>>, %arg5: memref<512x128xf32, #tpu.memory_space<vmem>>) attributes {dimension_semantics = [#tpu.dimension_semantics<parallel>], iteration_bounds = array<i64: 1>, scalar_prefetch = 0 : i64, scratch_operands = 0 : i64, tpu.core_type = #tpu.core_type<tc>, window_params = [{transform_indices = @transform_0, window_bounds = array<i64: 512, 4>}, {pipeline_mode = #tpu.pipeline_mode<synchronous>, transform_indices = @transform_1, window_bounds = array<i64: 4, 16>}, {pipeline_mode = #tpu.pipeline_mode<synchronous>, transform_indices = @transform_2, window_bounds = array<i64: 1, 16>}, {pipeline_mode = #tpu.pipeline_mode<synchronous>, transform_indices = @transform_3, window_bounds = array<i64: 16, 128>}, {transform_indices = @transform_4, window_bounds = array<i64: 512, 128>}]} {
    %c0 = arith.constant 0 : index
    %c0_0 = arith.constant 0 : index
    %0 = vector.load %arg1[%c0, %c0_0] : memref<512x4xf32, #tpu.memory_space<vmem>>, vector<512x4xf32>
    %c0_1 = arith.constant 0 : index
    %c0_2 = arith.constant 0 : index
    %1 = vector.load %arg2[%c0_1, %c0_2] : memref<4x16xf32, #tpu.memory_space<vmem>>, vector<4x16xf32>
    %cst = arith.constant dense<0.000000e+00> : vector<512x16xf32>
    %2 = tpu.matmul %0, %1, %cst {dimension_numbers = #tpu.dot_dimension_numbers<[1], [0], [0], [1], [0, 0, 1, 1], [], []>} : vector<512x4xf32>, vector<4x16xf32>, vector<512x16xf32> -> vector<512x16xf32>
    %c0_3 = arith.constant 0 : index
    %c0_4 = arith.constant 0 : index
    %3 = vector.load %arg3[%c0_3, %c0_4] : memref<1x16xf32, #tpu.memory_space<vmem>>, vector<1x16xf32>
    %4 = vector.broadcast %3 : vector<1x16xf32> to vector<512x16xf32>
    %5 = arith.addf %2, %4 : vector<512x16xf32>
    %cst_5 = arith.constant 0.000000e+00 : f32
    %6 = vector.broadcast %cst_5 : f32 to vector<512x16xf32>
    %7 = arith.maximumf %5, %6 : vector<512x16xf32>
    %c0_6 = arith.constant 0 : index
    %c0_7 = arith.constant 0 : index
    %8 = vector.load %arg4[%c0_6, %c0_7] : memref<16x128xf32, #tpu.memory_space<vmem>>, vector<16x128xf32>
    %cst_8 = arith.constant dense<0.000000e+00> : vector<512x128xf32>
    %9 = tpu.matmul %7, %8, %cst_8 {dimension_numbers = #tpu.dot_dimension_numbers<[1], [0], [0], [1], [0, 0, 1, 1], [], []>} : vector<512x16xf32>, vector<16x128xf32>, vector<512x128xf32> -> vector<512x128xf32>
    %cst_9 = arith.constant dense<0xFF800000> : vector<512xf32>
    %10 = vector.multi_reduction <maximumf>, %9, %cst_9 [1] : vector<512x128xf32> to vector<512xf32>
    %11 = vector.shape_cast %10 : vector<512xf32> to vector<512x1xf32>
    %12 = vector.broadcast %11 : vector<512x1xf32> to vector<512x128xf32>
    %13 = arith.subf %9, %12 : vector<512x128xf32>
    %14 = math.exp %13 : vector<512x128xf32>
    %cst_10 = arith.constant dense<0.000000e+00> : vector<512xf32>
    %15 = vector.multi_reduction <add>, %14, %cst_10 [1] : vector<512x128xf32> to vector<512xf32>
    %16 = vector.shape_cast %15 : vector<512xf32> to vector<512x1xf32>
    %17 = vector.broadcast %16 : vector<512x1xf32> to vector<512x128xf32>
    %18 = arith.divf %14, %17 : vector<512x128xf32>
    %c0_11 = arith.constant 0 : index
    %c0_12 = arith.constant 0 : index
    %19 = vector.load %arg5[%c0_11, %c0_12] : memref<512x128xf32, #tpu.memory_space<vmem>>, vector<512x128xf32>
    tpu.vector_store %arg5[%c0_11, %c0_12], %18 {strides = array<i32>} : memref<512x128xf32, #tpu.memory_space<vmem>>, vector<512x128xf32>,
    return
  }
  func.func @transform_0(%arg0: i32) -> (i32, i32) {
    %c0_i32 = arith.constant 0 : i32
    %c0_i32_0 = arith.constant 0 : i32
    return %arg0, %c0_i32 : i32, i32
  }
  func.func @transform_1(%arg0: i32) -> (i32, i32) {
    %c0_i32 = arith.constant 0 : i32
    %c0_i32_0 = arith.constant 0 : i32
    %c0_i32_1 = arith.constant 0 : i32
    return %c0_i32, %c0_i32_0 : i32, i32
  }
  func.func @transform_2(%arg0: i32) -> (i32, i32) {
    %c0_i32 = arith.constant 0 : i32
    %c0_i32_0 = arith.constant 0 : i32
    %c0_i32_1 = arith.constant 0 : i32
    return %c0_i32, %c0_i32_0 : i32, i32
  }
  func.func @transform_3(%arg0: i32) -> (i32, i32) {
    %c0_i32 = arith.constant 0 : i32
    %c0_i32_0 = arith.constant 0 : i32
    %c0_i32_1 = arith.constant 0 : i32
    return %c0_i32, %c0_i32_0 : i32, i32
  }
  func.func @transform_4(%arg0: i32) -> (i32, i32) {
    %c0_i32 = arith.constant 0 : i32
    %c0_i32_0 = arith.constant 0 : i32
    return %arg0, %c0_i32 : i32, i32
  }
}

</mosaic_0001>

<bundles_post_ra>
// kernel: tpu_custom_call.1
= control target key start
LH: loop header
LB: loop body
LE: loop exit
PB: predicated region body
PF: predicated region fallthrough
CT: control target
= control target key end

     0   :  { %vm283_vm0 = vcmask 1043456   ;;  %vm90_vm1 = vcmask 31744   ;;  %s3668_s0 = inlined_call_operand.vmem [shape: f32[512,4], index: 0, kind: input, shape index: {}]   ;;  %s3669_s1 = inlined_call_operand.vmem [shape: f32[4,16], index: 1, kind: input, shape index: {}]   ;;  %s3670_s2 = inlined_call_operand.vmem [shape: f32[1,16], index: 2, kind: input, shape index: {}]   ;;  %s3671_s3 = inlined_call_operand.vmem [shape: f32[16,128], index: 3, kind: input, shape index: {}]   ;;  %s3672_s4 = inlined_call_operand.hbm [shape: f32[512,128], index: 4, kind: output, shape index: {}]  }
   0x1   :  { %v82_v0 = vld [vmem:[%s3669_s1] sm:$0xf]  ;;  %v19_v2 = vld [vmem:[%s3668_s0 + $0x8] sm:$0xff]  ;;  %v20_v3 = vld [vmem:[%s3668_s0 + $0x10] sm:$0xff] }
   0x2   :  { %v18_v1 = vld [vmem:[%s3668_s0] sm:$0xff]  ;;  %2233 = vmatprep.subr.msk.mxu0 %vm283_vm0, %v82_v0  ;;  %v21_v4 = vld [vmem:[%s3668_s0 + $0x18] sm:$0xff]  ;;  %v23_v6 = vld [vmem:[%s3668_s0 + $0x28] sm:$0xff] }
   0x3   :  { %2235 = vmatprep.mubr.msk.f32.mxu0 %vm90_vm1, %v18_v1  ;;  %2234 = vmatpush3.msk.msra.mxu0 %vm283_vm0, %v82_v0  ;;  %v22_v5 = vld [vmem:[%s3668_s0 + $0x20] sm:$0xff]  ;;  %v24_v7 = vld [vmem:[%s3668_s0 + $0x30] sm:$0xff]  ;;  %v25_v8 = vld [vmem:[%s3668_s0 + $0x38] sm:$0xff] }
   0x4   :  { %2236 = vmatmul.mubr.msk.f32.vlgmr.msra.gmra.mrb[0].mxu0 %vm90_vm1, %v19_v2  ;;  %v26_v9 = vld [vmem:[%s3668_s0 + $0x40] sm:$0xff]  ;;  %v27_v10 = vld [vmem:[%s3668_s0 + $0x48] sm:$0xff]  ;;  %v28_v11 = vld [vmem:[%s3668_s0 + $0x50] sm:$0xff] }
   0x5   :  { %2238 = vmatprep.mubr.msk.f32.mxu0 %vm90_vm1, %v20_v3  ;;  %v29_v12 = vld [vmem:[%s3668_s0 + $0x58] sm:$0xff]  ;;  %v30_v13 = vld [vmem:[%s3668_s0 + $0x60] sm:$0xff] }
   0x8   :  { %2239 = vmatmul.mubr.msk.f32.gmra.mrb[2].mxu0 %vm90_vm1, %v21_v4 }
   0x9   :  { %2241 = vmatprep.mubr.msk.f32.mxu0 %vm90_vm1, %v22_v5 }
   0xc   :  { %2242 = vmatmul.mubr.msk.f32.gmra.mrb[4].mxu0 %vm90_vm1, %v23_v6 }
   0xd   :  { %2244 = vmatprep.mubr.msk.f32.mxu0 %vm90_vm1, %v24_v7 }
  0x10   :  { %2245 = vmatmul.mubr.msk.f32.gmra.mrb[6].mxu0 %vm90_vm1, %v25_v8 }
  0x11   :  { %2247 = vmatprep.mubr.msk.f32.mxu0 %vm90_vm1, %v26_v9 }
  0x14   :  { %2248 = vmatmul.mubr.msk.f32.gmra.mrb[8].mxu0 %vm90_vm1, %v27_v10 }
  0x15   :  { %2250 = vmatprep.mubr.msk.f32.mxu0 %vm90_vm1, %v28_v11 }
  0x16   :  { %9 = vsyncpa [#allocation3], 0  ;;  %v31_v14 = vld [vmem:[%s3668_s0 + $0x68] sm:$0xff]  ;;  %v32_v15 = vld [vmem:[%s3668_s0 + $0x70] sm:$0xff]  ;;  %vm738_vm2 = vcmask 130048  }
  0x17   :  { %v33_v16 = vld [vmem:[%s3668_s0 + $0x78] sm:$0xff]  ;;  %v34_v17 = vld [vmem:[%s3668_s0 + $0x80] sm:$0xff]  ;;  %v35_v18 = vld [vmem:[%s3668_s0 + $0x88] sm:$0xff] }
  0x18   :  { %2251 = vmatmul.mubr.msk.f32.gmra.mrb[10].mxu0 %vm90_vm1, %v29_v12  ;;  %v36_v19 = vld [vmem:[%s3668_s0 + $0x90] sm:$0xff]  ;;  %v37_v20 = vld [vmem:[%s3668_s0 + $0x98] sm:$0xff]  ;;  %v38_v21 = vld [vmem:[%s3668_s0 + $0xa0] sm:$0xff] }
  0x19   :  { %2253 = vmatprep.mubr.msk.f32.mxu0 %vm90_vm1, %v30_v13  ;;  %v39_v22 = vld [vmem:[%s3668_s0 + $0xa8] sm:$0xff]  ;;  %v40_v23 = vld [vmem:[%s3668_s0 + $0xb0] sm:$0xff]  ;;  %v41_v24 = vld [vmem:[%s3668_s0 + $0xb8] sm:$0xff] }
  0x1a   :  { %v42_v25 = vld [vmem:[%s3668_s0 + $0xc0] sm:$0xff]  ;;  %v43_v26 = vld [vmem:[%s3668_s0 + $0xc8] sm:$0xff]  ;;  %v44_v27 = vld [vmem:[%s3668_s0 + $0xd0] sm:$0xff] }
  0x1b   :  { %v45_v28 = vld [vmem:[%s3668_s0 + $0xd8] sm:$0xff]  ;;  %v46_v29 = vld [vmem:[%s3668_s0 + $0xe0] sm:$0xff]  ;;  %v47_v30 = vld [vmem:[%s3668_s0 + $0xe8] sm:$0xff] }
  0x1c   :  { %2254 = vmatmul.mubr.msk.f32.gmra.mrb[12].mxu0 %vm90_vm1, %v31_v14  ;;  %v48_v31 = vld [vmem:[%s3668_s0 + $0xf0] sm:$0xff]  ;;  %v49_v32 = vld [vmem:[%s3668_s0 + $0xf8] sm:$0xff]  ;;  %v50_v33 = vld [vmem:[%s3668_s0 + $0x100] sm:$0xff] }
  0x1d   :  { %2256 = vmatprep.mubr.msk.f32.mxu0 %vm90_vm1, %v32_v15  ;;  %v51_v34 = vld [vmem:[%s3668_s0 + $0x108] sm:$0xff]  ;;  %v52_v35 = vld [vmem:[%s3668_s0 + $0x110] sm:$0xff]  ;;  %v53_v36 = vld [vmem:[%s3668_s0 + $0x118] sm:$0xff] }
  0x1e   :  { %v54_v37 = vld [vmem:[%s3668_s0 + $0x120] sm:$0xff]  ;;  %v55_v38 = vld [vmem:[%s3668_s0 + $0x128] sm:$0xff]  ;;  %v56_v39 = vld [vmem:[%s3668_s0 + $0x130] sm:$0xff] }
  0x1f   :  { %v57_v40 = vld [vmem:[%s3668_s0 + $0x138] sm:$0xff]  ;;  %v58_v41 = vld [vmem:[%s3668_s0 + $0x140] sm:$0xff]  ;;  %v59_v42 = vld [vmem:[%s3668_s0 + $0x148] sm:$0xff] }
  0x20   :  { %2257 = vmatmul.mubr.msk.f32.gmra.mrb[14].mxu0 %vm90_vm1, %v33_v16  ;;  %v60_v43 = vld [vmem:[%s3668_s0 + $0x150] sm:$0xff]  ;;  %v61_v44 = vld [vmem:[%s3668_s0 + $0x158] sm:$0xff]  ;;  %v62_v45 = vld [vmem:[%s3668_s0 + $0x160] sm:$0xff] }
  0x21   :  { %2259 = vmatprep.mubr.msk.f32.mxu0 %vm90_vm1, %v34_v17  ;;  %v736_v46 = vld [vmem:[%s3671_s3] sm:$0xff]  ;;  %v737_v47 = vld [vmem:[%s3671_s3 + $0x8] sm:$0xff]  ;;  %v64_v50 = vld [vmem:[%s3668_s0 + $0x170] sm:$0xff] }
  0x22   :  { %v2431_v48 = vpack.c.bf16 %v737_v47, %v736_v46  ;;  %v63_v49 = vld [vmem:[%s3668_s0 + $0x168] sm:$0xff]  ;;  %v65_v51 = vld [vmem:[%s3668_s0 + $0x178] sm:$0xff]  ;;  %v66_v52 = vld [vmem:[%s3668_s0 + $0x180] sm:$0xff] }
  0x23   :  { %v67_v53 = vld [vmem:[%s3668_s0 + $0x188] sm:$0xff]  ;;  %v68_v54 = vld [vmem:[%s3668_s0 + $0x190] sm:$0xff]  ;;  %v69_v55 = vld [vmem:[%s3668_s0 + $0x198] sm:$0xff] }
  0x24   :  { %2260 = vmatmul.mubr.msk.f32.gmra.mrb[16].mxu0 %vm90_vm1, %v35_v18  ;;  %2432 = vmatprep.subr.bf16.mxu1 %v2431_v48  ;;  %v70_v56 = vld [vmem:[%s3668_s0 + $0x1a0] sm:$0xff]  ;;  %v71_v57 = vld [vmem:[%s3668_s0 + $0x1a8] sm:$0xff]  ;;  %v72_v58 = vld [vmem:[%s3668_s0 + $0x1b0] sm:$0xff] }
  0x25   :  { %2262 = vmatprep.mubr.msk.f32.mxu0 %vm90_vm1, %v36_v19  ;;  %2434 = vmatpush3.bf16.msra.mxu1 %v2431_v48  ;;  %v73_v59 = vld [vmem:[%s3668_s0 + $0x1b8] sm:$0xff]  ;;  %v74_v60 = vld [vmem:[%s3668_s0 + $0x1c0] sm:$0xff]  ;;  %v75_v61 = vld [vmem:[%s3668_s0 + $0x1c8] sm:$0xff] }
  0x26   :  { %v76_v62 = vld [vmem:[%s3668_s0 + $0x1d0] sm:$0xff]  ;;  %v77_v63 = vld [vmem:[%s3668_s0 + $0x1d8] sm:$0xff]  ;;  %v78_v0 = vld [vmem:[%s3668_s0 + $0x1e0] sm:$0xff] }
  0x27   :  { %v79_v1 = vld [vmem:[%s3668_s0 + $0x1e8] sm:$0xff]  ;;  %v80_v2 = vld [vmem:[%s3668_s0 + $0x1f0] sm:$0xff]  ;;  %v81_v3 = vld [vmem:[%s3668_s0 + $0x1f8] sm:$0xff]  ;;  %s2718_s0 = smov [#allocation2]  }
  0x28   :  { %2263 = vmatmul.mubr.msk.f32.gmra.mrb[18].mxu0 %vm90_vm1, %v37_v20  ;;  %v3014_v4 = vld [vmem:[%s3670_s2] ss:$0 sm:$0xff]  ;;  %s1961_s2 = sshll.u32 %s2718_s0, 4  ;;  %s1962_s2 = int_to_ptr.vmem [resolvable:$true] %s1961_s2 }
  0x29   :  { %2265 = vmatprep.mubr.msk.f32.mxu0 %vm90_vm1, %v38_v21  ;;  %s2694_s14 = scalar_lea.vmem %s1962_s2, 8192  ;;  %p2699_p1 = scmp.lt.s32.totalorder %s1962_s2, %s1962_s2 }
  0x2a   :  { %p2695_p0 = scmp.ne.s32.totalorder %s1962_s2, %s2694_s14  ;;  %p2700_p2 = scmp.lt.s32.totalorder %s2694_s14, %s2694_s14 }
  0x2c   :  { %2266 = vmatmul.mubr.msk.f32.gmra.mrb[20].mxu0 %vm90_vm1, %v39_v22  ;;  %p2701_p3 = por %p2700_p2, %p2699_p1 }
  0x2d   :  { %2268 = vmatprep.mubr.msk.f32.mxu0 %vm90_vm1, %v40_v23 }
  0x2e   :  { %p2702_p4 = pnand %p2701_p3, %p2695_p0 }
  0x30   :  { %2269 = vmatmul.mubr.msk.f32.gmra.mrb[22].mxu0 %vm90_vm1, %v41_v24 }
  0x31   :  { %2271 = vmatprep.mubr.msk.f32.mxu0 %vm90_vm1, %v42_v25 }
  0x34   :  { %2272 = vmatmul.mubr.msk.f32.gmra.mrb[24].mxu0 %vm90_vm1, %v43_v26 }
  0x35   :  { %2274 = vmatprep.mubr.msk.f32.mxu0 %vm90_vm1, %v44_v27 }
  0x38   :  { %2275 = vmatmul.mubr.msk.f32.gmra.mrb[26].mxu0 %vm90_vm1, %v45_v28 }
  0x39   :  { %2277 = vmatprep.mubr.msk.f32.mxu0 %vm90_vm1, %v46_v29 }
  0x3c   :  { %2278 = vmatmul.mubr.msk.f32.gmra.mrb[28].mxu0 %vm90_vm1, %v47_v30 }
  0x3d   :  { %2280 = vmatprep.mubr.msk.f32.mxu0 %vm90_vm1, %v48_v31 }
  0x40   :  { %2281 = vmatmul.mubr.msk.f32.gmra.mrb[30].mxu0 %vm90_vm1, %v49_v32 }
  0x41   :  { %2283 = vmatprep.mubr.msk.f32.mxu0 %vm90_vm1, %v50_v33 }
  0x44   :  { %2284 = vmatmul.mubr.msk.f32.gmra.mrb[32].mxu0 %vm90_vm1, %v51_v34 }
  0x45   :  { %2286 = vmatprep.mubr.msk.f32.mxu0 %vm90_vm1, %v52_v35 }
  0x48   :  { %2287 = vmatmul.mubr.msk.f32.gmra.mrb[34].mxu0 %vm90_vm1, %v53_v36 }
  0x49   :  { %2289 = vmatprep.mubr.msk.f32.mxu0 %vm90_vm1, %v54_v37 }
  0x4c   :  { %2290 = vmatmul.mubr.msk.f32.gmra.mrb[36].mxu0 %vm90_vm1, %v55_v38 }
  0x4d   :  { %2292 = vmatprep.mubr.msk.f32.mxu0 %vm90_vm1, %v56_v39 }
  0x50   :  { %2293 = vmatmul.mubr.msk.f32.gmra.mrb[38].mxu0 %vm90_vm1, %v57_v40 }
  0x51   :  { %2295 = vmatprep.mubr.msk.f32.mxu0 %vm90_vm1, %v58_v41 }
  0x54   :  { %2296 = vmatmul.mubr.msk.f32.gmra.mrb[40].mxu0 %vm90_vm1, %v59_v42 }
  0x55   :  { %2298 = vmatprep.mubr.msk.f32.mxu0 %vm90_vm1, %v60_v43 }
  0x58   :  { %2299 = vmatmul.mubr.msk.f32.gmra.mrb[42].mxu0 %vm90_vm1, %v61_v44 }
  0x59   :  { %2301 = vmatprep.mubr.msk.f32.mxu0 %vm90_vm1, %v62_v45 }
  0x5c   :  { %2302 = vmatmul.mubr.msk.f32.gmra.mrb[44].mxu0 %vm90_vm1, %v63_v49 }
  0x5d   :  { %2304 = vmatprep.mubr.msk.f32.mxu0 %vm90_vm1, %v64_v50 }
  0x60   :  { %2305 = vmatmul.mubr.msk.f32.gmra.mrb[46].mxu0 %vm90_vm1, %v65_v51 }
  0x61   :  { %2307 = vmatprep.mubr.msk.f32.mxu0 %vm90_vm1, %v66_v52 }
  0x64   :  { %2308 = vmatmul.mubr.msk.f32.gmra.mrb[48].mxu0 %vm90_vm1, %v67_v53 }
  0x65   :  { %2310 = vmatprep.mubr.msk.f32.mxu0 %vm90_vm1, %v68_v54 }
  0x68   :  { %2311 = vmatmul.mubr.msk.f32.gmra.mrb[50].mxu0 %vm90_vm1, %v69_v55 }
  0x69   :  { %2313 = vmatprep.mubr.msk.f32.mxu0 %vm90_vm1, %v70_v56 }
  0x6c   :  { %2314 = vmatmul.mubr.msk.f32.gmra.mrb[52].mxu0 %vm90_vm1, %v71_v57 }
  0x6d   :  { %2316 = vmatprep.mubr.msk.f32.mxu0 %vm90_vm1, %v72_v58 }
  0x70   :  { %2317 = vmatmul.mubr.msk.f32.gmra.mrb[54].mxu0 %vm90_vm1, %v73_v59 }
  0x71   :  { %2319 = vmatprep.mubr.msk.f32.mxu0 %vm90_vm1, %v74_v60 }
  0x74   :  { %2320 = vmatmul.mubr.msk.f32.gmra.mrb[56].mxu0 %vm90_vm1, %v75_v61 }
  0x75   :  { %2322 = vmatprep.mubr.msk.f32.mxu0 %vm90_vm1, %v76_v62 }
  0x78   :  { %2323 = vmatmul.mubr.msk.f32.gmra.mrb[58].mxu0 %vm90_vm1, %v77_v63 }
  0x79   :  { %2325 = vmatprep.mubr.msk.f32.mxu0 %vm90_vm1, %v78_v0 }
  0x7c   :  { %2326 = vmatmul.mubr.msk.f32.gmra.mrb[60].mxu0 %vm90_vm1, %v79_v1 }
  0x7d   :  { %2328 = vmatprep.mubr.msk.f32.mxu0 %vm90_vm1, %v80_v2 }
  0x80   :  { %2329 = vmatmul.mubr.msk.f32.gmra.mrb[62].mxu0 %vm90_vm1, %v81_v3 }
  0xd7   :  { %v2237_v5 = vpop.f32.mrb[0].mxu0 }
  0xd8   :  { %v359_v6 = vadd.f32 %v2237_v5, %v3014_v4  ;;  %v353_v7 = vpop.f32.mrb[1].mxu0 }
  0xd9   :  { %v354_v8 = vadd.f32 %v3014_v4, %v353_v7 }
  0xda   :  { %v673_v11 = vmax.f32 %v359_v6, 0.0 }
  0xdb   :  { %v672_v9 = vmax.f32 %v354_v8, 0.0  ;;  %v2240_v10 = vpop.f32.mrb[2].mxu0 }
  0xdc   :  { %v369_v12 = vadd.f32 %v2240_v10, %v3014_v4  ;;  %v363_v13 = vpop.f32.mrb[3].mxu0 }
  0xdd   :  { %v364_v14 = vadd.f32 %v3014_v4, %v363_v13  ;;  %2335 = vmatprep.mubr.msk.f32.mxu1 %vm738_vm2, %v672_v9 }
  0xde   :  { %2336 = vmatmul.mubr.msk.f32.vlgmr.msra.gmra.mrb[0].mxu1 %vm738_vm2, %v673_v11  ;;  %v675_v17 = vmax.f32 %v369_v12, 0.0 }
  0xdf   :  { %v674_v15 = vmax.f32 %v364_v14, 0.0  ;;  %v2243_v16 = vpop.f32.mrb[4].mxu0 }
  0xe0   :  { %v379_v18 = vadd.f32 %v2243_v16, %v3014_v4  ;;  %v373_v19 = vpop.f32.mrb[5].mxu0 }
  0xe1   :  { %v374_v20 = vadd.f32 %v3014_v4, %v373_v19  ;;  %2338 = vmatprep.mubr.msk.f32.mxu1 %vm738_vm2, %v674_v15 }
  0xe2   :  { %v677_v21 = vmax.f32 %v379_v18, 0.0  ;;  %2339 = vmatmul.mubr.msk.f32.gmra.mrb[2].mxu1 %vm738_vm2, %v675_v17 }
  0xe3   :  { %v676_v22 = vmax.f32 %v374_v20, 0.0  ;;  %v2246_v23 = vpop.f32.mrb[6].mxu0 }
  0xe4   :  { %v389_v24 = vadd.f32 %v2246_v23, %v3014_v4  ;;  %v383_v25 = vpop.f32.mrb[7].mxu0 }
  0xe5   :  { %v384_v26 = vadd.f32 %v3014_v4, %v383_v25  ;;  %2341 = vmatprep.mubr.msk.f32.mxu1 %vm738_vm2, %v676_v22 }
  0xe6   :  { %v679_v27 = vmax.f32 %v389_v24, 0.0  ;;  %2342 = vmatmul.mubr.msk.f32.gmra.mrb[4].mxu1 %vm738_vm2, %v677_v21 }
  0xe7   :  { %v678_v28 = vmax.f32 %v384_v26, 0.0  ;;  %v2249_v29 = vpop.f32.mrb[8].mxu0 }
  0xe8   :  { %v399_v30 = vadd.f32 %v2249_v29, %v3014_v4  ;;  %v393_v31 = vpop.f32.mrb[9].mxu0 }
  0xe9   :  { %v394_v32 = vadd.f32 %v3014_v4, %v393_v31  ;;  %2344 = vmatprep.mubr.msk.f32.mxu1 %vm738_vm2, %v678_v28 }
  0xea   :  { %v681_v33 = vmax.f32 %v399_v30, 0.0  ;;  %2345 = vmatmul.mubr.msk.f32.gmra.mrb[6].mxu1 %vm738_vm2, %v679_v27 }
  0xeb   :  { %v680_v34 = vmax.f32 %v394_v32, 0.0  ;;  %v2252_v35 = vpop.f32.mrb[10].mxu0 }
  0xec   :  { %v409_v36 = vadd.f32 %v2252_v35, %v3014_v4  ;;  %v403_v37 = vpop.f32.mrb[11].mxu0 }
  0xed   :  { %v404_v38 = vadd.f32 %v3014_v4, %v403_v37  ;;  %2347 = vmatprep.mubr.msk.f32.mxu1 %vm738_vm2, %v680_v34 }
  0xee   :  { %v683_v39 = vmax.f32 %v409_v36, 0.0  ;;  %2348 = vmatmul.mubr.msk.f32.gmra.mrb[8].mxu1 %vm738_vm2, %v681_v33 }
  0xef   :  { %v682_v40 = vmax.f32 %v404_v38, 0.0  ;;  %v2255_v41 = vpop.f32.mrb[12].mxu0 }
  0xf0   :  { %v419_v42 = vadd.f32 %v2255_v41, %v3014_v4  ;;  %v413_v43 = vpop.f32.mrb[13].mxu0 }
  0xf1   :  { %v414_v44 = vadd.f32 %v3014_v4, %v413_v43  ;;  %2350 = vmatprep.mubr.msk.f32.mxu1 %vm738_vm2, %v682_v40 }
  0xf2   :  { %v685_v45 = vmax.f32 %v419_v42, 0.0  ;;  %2351 = vmatmul.mubr.msk.f32.gmra.mrb[10].mxu1 %vm738_vm2, %v683_v39 }
  0xf3   :  { %v684_v46 = vmax.f32 %v414_v44, 0.0  ;;  %v2258_v47 = vpop.f32.mrb[14].mxu0 }
  0xf4   :  { %v429_v48 = vadd.f32 %v2258_v47, %v3014_v4  ;;  %v423_v49 = vpop.f32.mrb[15].mxu0 }
  0xf5   :  { %v424_v50 = vadd.f32 %v3014_v4, %v423_v49  ;;  %2353 = vmatprep.mubr.msk.f32.mxu1 %vm738_vm2, %v684_v46 }
  0xf6   :  { %v687_v51 = vmax.f32 %v429_v48, 0.0  ;;  %2354 = vmatmul.mubr.msk.f32.gmra.mrb[12].mxu1 %vm738_vm2, %v685_v45 }
  0xf7   :  { %v686_v52 = vmax.f32 %v424_v50, 0.0  ;;  %v2261_v53 = vpop.f32.mrb[16].mxu0 }
  0xf8   :  { %v439_v54 = vadd.f32 %v2261_v53, %v3014_v4  ;;  %v433_v55 = vpop.f32.mrb[17].mxu0 }
  0xf9   :  { %v434_v56 = vadd.f32 %v3014_v4, %v433_v55  ;;  %2356 = vmatprep.mubr.msk.f32.mxu1 %vm738_vm2, %v686_v52 }
  0xfa   :  { %v689_v57 = vmax.f32 %v439_v54, 0.0  ;;  %2357 = vmatmul.mubr.msk.f32.gmra.mrb[14].mxu1 %vm738_vm2, %v687_v51 }
  0xfb   :  { %v688_v58 = vmax.f32 %v434_v56, 0.0  ;;  %v2264_v59 = vpop.f32.mrb[18].mxu0 }
  0xfc   :  { %v449_v60 = vadd.f32 %v2264_v59, %v3014_v4  ;;  %v443_v61 = vpop.f32.mrb[19].mxu0 }
  0xfd   :  { %v444_v62 = vadd.f32 %v3014_v4, %v443_v61  ;;  %2359 = vmatprep.mubr.msk.f32.mxu1 %vm738_vm2, %v688_v58 }
  0xfe   :  { %v691_v63 = vmax.f32 %v449_v60, 0.0  ;;  %2360 = vmatmul.mubr.msk.f32.gmra.mrb[16].mxu1 %vm738_vm2, %v689_v57 }
  0xff   :  { %v690_v0 = vmax.f32 %v444_v62, 0.0  ;;  %v2267_v1 = vpop.f32.mrb[20].mxu0 }
 0x100   :  { %v459_v2 = vadd.f32 %v2267_v1, %v3014_v4  ;;  %v453_v3 = vpop.f32.mrb[21].mxu0 }
 0x101   :  { %v454_v5 = vadd.f32 %v3014_v4, %v453_v3  ;;  %2362 = vmatprep.mubr.msk.f32.mxu1 %vm738_vm2, %v690_v0 }
 0x102   :  { %v693_v6 = vmax.f32 %v459_v2, 0.0  ;;  %2363 = vmatmul.mubr.msk.f32.gmra.mrb[18].mxu1 %vm738_vm2, %v691_v63 }
 0x103   :  { %v692_v7 = vmax.f32 %v454_v5, 0.0  ;;  %v2270_v8 = vpop.f32.mrb[22].mxu0 }
 0x104   :  { %v469_v9 = vadd.f32 %v2270_v8, %v3014_v4  ;;  %v463_v10 = vpop.f32.mrb[23].mxu0 }
 0x105   :  { %v464_v11 = vadd.f32 %v3014_v4, %v463_v10  ;;  %2365 = vmatprep.mubr.msk.f32.mxu1 %vm738_vm2, %v692_v7 }
 0x106   :  { %v695_v12 = vmax.f32 %v469_v9, 0.0  ;;  %2366 = vmatmul.mubr.msk.f32.gmra.mrb[20].mxu1 %vm738_vm2, %v693_v6 }
 0x107   :  { %v694_v13 = vmax.f32 %v464_v11, 0.0  ;;  %v2273_v14 = vpop.f32.mrb[24].mxu0 }
 0x108   :  { %v479_v15 = vadd.f32 %v2273_v14, %v3014_v4  ;;  %v473_v16 = vpop.f32.mrb[25].mxu0 }
 0x109   :  { %v474_v17 = vadd.f32 %v3014_v4, %v473_v16  ;;  %2368 = vmatprep.mubr.msk.f32.mxu1 %vm738_vm2, %v694_v13 }
 0x10a   :  { %v697_v18 = vmax.f32 %v479_v15, 0.0  ;;  %2369 = vmatmul.mubr.msk.f32.gmra.mrb[22].mxu1 %vm738_vm2, %v695_v12 }
 0x10b   :  { %v696_v19 = vmax.f32 %v474_v17, 0.0  ;;  %v2276_v20 = vpop.f32.mrb[26].mxu0 }
 0x10c   :  { %v489_v21 = vadd.f32 %v2276_v20, %v3014_v4  ;;  %v483_v22 = vpop.f32.mrb[27].mxu0 }
 0x10d   :  { %v484_v23 = vadd.f32 %v3014_v4, %v483_v22  ;;  %2371 = vmatprep.mubr.msk.f32.mxu1 %vm738_vm2, %v696_v19 }
 0x10e   :  { %v699_v24 = vmax.f32 %v489_v21, 0.0  ;;  %2372 = vmatmul.mubr.msk.f32.gmra.mrb[24].mxu1 %vm738_vm2, %v697_v18 }
 0x10f   :  { %v698_v25 = vmax.f32 %v484_v23, 0.0  ;;  %v2279_v26 = vpop.f32.mrb[28].mxu0 }
 0x110   :  { %v499_v27 = vadd.f32 %v2279_v26, %v3014_v4  ;;  %v493_v28 = vpop.f32.mrb[29].mxu0 }
 0x111   :  { %v494_v29 = vadd.f32 %v3014_v4, %v493_v28  ;;  %2374 = vmatprep.mubr.msk.f32.mxu1 %vm738_vm2, %v698_v25 }
 0x112   :  { %v701_v30 = vmax.f32 %v499_v27, 0.0  ;;  %2375 = vmatmul.mubr.msk.f32.gmra.mrb[26].mxu1 %vm738_vm2, %v699_v24 }
 0x113   :  { %v700_v31 = vmax.f32 %v494_v29, 0.0  ;;  %v2282_v32 = vpop.f32.mrb[30].mxu0 }
 0x114   :  { %v509_v33 = vadd.f32 %v2282_v32, %v3014_v4  ;;  %v503_v34 = vpop.f32.mrb[31].mxu0 }
 0x115   :  { %v504_v35 = vadd.f32 %v3014_v4, %v503_v34  ;;  %2377 = vmatprep.mubr.msk.f32.mxu1 %vm738_vm2, %v700_v31 }
 0x116   :  { %v703_v36 = vmax.f32 %v509_v33, 0.0  ;;  %2378 = vmatmul.mubr.msk.f32.gmra.mrb[28].mxu1 %vm738_vm2, %v701_v30 }
 0x117   :  { %v702_v37 = vmax.f32 %v504_v35, 0.0  ;;  %v2285_v38 = vpop.f32.mrb[32].mxu0 }
 0x118   :  { %v519_v39 = vadd.f32 %v2285_v38, %v3014_v4  ;;  %v513_v40 = vpop.f32.mrb[33].mxu0 }
 0x119   :  { %v514_v41 = vadd.f32 %v3014_v4, %v513_v40  ;;  %2380 = vmatprep.mubr.msk.f32.mxu1 %vm738_vm2, %v702_v37 }
 0x11a   :  { %v705_v42 = vmax.f32 %v519_v39, 0.0  ;;  %2381 = vmatmul.mubr.msk.f32.gmra.mrb[30].mxu1 %vm738_vm2, %v703_v36 }
 0x11b   :  { %v704_v43 = vmax.f32 %v514_v41, 0.0  ;;  %v2288_v44 = vpop.f32.mrb[34].mxu0 }
 0x11c   :  { %v529_v45 = vadd.f32 %v2288_v44, %v3014_v4  ;;  %v523_v46 = vpop.f32.mrb[35].mxu0 }
 0x11d   :  { %v524_v47 = vadd.f32 %v3014_v4, %v523_v46  ;;  %2383 = vmatprep.mubr.msk.f32.mxu1 %vm738_vm2, %v704_v43 }
 0x11e   :  { %v707_v48 = vmax.f32 %v529_v45, 0.0  ;;  %2384 = vmatmul.mubr.msk.f32.gmra.mrb[32].mxu1 %vm738_vm2, %v705_v42 }
 0x11f   :  { %v706_v49 = vmax.f32 %v524_v47, 0.0  ;;  %v2291_v50 = vpop.f32.mrb[36].mxu0 }
 0x120   :  { %v539_v51 = vadd.f32 %v2291_v50, %v3014_v4  ;;  %v533_v52 = vpop.f32.mrb[37].mxu0 }
 0x121   :  { %v534_v53 = vadd.f32 %v3014_v4, %v533_v52  ;;  %2386 = vmatprep.mubr.msk.f32.mxu1 %vm738_vm2, %v706_v49 }
 0x122   :  { %v709_v54 = vmax.f32 %v539_v51, 0.0  ;;  %2387 = vmatmul.mubr.msk.f32.gmra.mrb[34].mxu1 %vm738_vm2, %v707_v48 }
 0x123   :  { %v708_v55 = vmax.f32 %v534_v53, 0.0  ;;  %v2294_v56 = vpop.f32.mrb[38].mxu0 }
 0x124   :  { %v549_v57 = vadd.f32 %v2294_v56, %v3014_v4  ;;  %v543_v58 = vpop.f32.mrb[39].mxu0 }
 0x125   :  { %v544_v59 = vadd.f32 %v3014_v4, %v543_v58  ;;  %2389 = vmatprep.mubr.msk.f32.mxu1 %vm738_vm2, %v708_v55 }
 0x126   :  { %v711_v60 = vmax.f32 %v549_v57, 0.0  ;;  %2390 = vmatmul.mubr.msk.f32.gmra.mrb[36].mxu1 %vm738_vm2, %v709_v54 }
 0x127   :  { %v710_v61 = vmax.f32 %v544_v59, 0.0  ;;  %v2297_v62 = vpop.f32.mrb[40].mxu0 }
 0x128   :  { %v559_v63 = vadd.f32 %v2297_v62, %v3014_v4  ;;  %v553_v0 = vpop.f32.mrb[41].mxu0 }
 0x129   :  { %v554_v1 = vadd.f32 %v3014_v4, %v553_v0  ;;  %2392 = vmatprep.mubr.msk.f32.mxu1 %vm738_vm2, %v710_v61 }
 0x12a   :  { %v713_v2 = vmax.f32 %v559_v63, 0.0  ;;  %2393 = vmatmul.mubr.msk.f32.gmra.mrb[38].mxu1 %vm738_vm2, %v711_v60 }
 0x12b   :  { %v712_v3 = vmax.f32 %v554_v1, 0.0  ;;  %v2300_v5 = vpop.f32.mrb[42].mxu0 }
 0x12c   :  { %v569_v6 = vadd.f32 %v2300_v5, %v3014_v4  ;;  %v563_v7 = vpop.f32.mrb[43].mxu0 }
 0x12d   :  { %v564_v8 = vadd.f32 %v3014_v4, %v563_v7  ;;  %2395 = vmatprep.mubr.msk.f32.mxu1 %vm738_vm2, %v712_v3 }
 0x12e   :  { %v715_v9 = vmax.f32 %v569_v6, 0.0  ;;  %2396 = vmatmul.mubr.msk.f32.gmra.mrb[40].mxu1 %vm738_vm2, %v713_v2 }
 0x12f   :  { %v714_v10 = vmax.f32 %v564_v8, 0.0  ;;  %v2303_v11 = vpop.f32.mrb[44].mxu0 }
 0x130   :  { %v579_v12 = vadd.f32 %v2303_v11, %v3014_v4  ;;  %v573_v13 = vpop.f32.mrb[45].mxu0 }
 0x131   :  { %v574_v14 = vadd.f32 %v3014_v4, %v573_v13  ;;  %2398 = vmatprep.mubr.msk.f32.mxu1 %vm738_vm2, %v714_v10 }
 0x132   :  { %v717_v15 = vmax.f32 %v579_v12, 0.0  ;;  %2399 = vmatmul.mubr.msk.f32.gmra.mrb[42].mxu1 %vm738_vm2, %v715_v9 }
 0x133   :  { %v716_v16 = vmax.f32 %v574_v14, 0.0  ;;  %v2306_v17 = vpop.f32.mrb[46].mxu0 }
 0x134   :  { %v589_v18 = vadd.f32 %v2306_v17, %v3014_v4  ;;  %v583_v19 = vpop.f32.mrb[47].mxu0 }
 0x135   :  { %v584_v20 = vadd.f32 %v3014_v4, %v583_v19  ;;  %2401 = vmatprep.mubr.msk.f32.mxu1 %vm738_vm2, %v716_v16 }
 0x136   :  { %v719_v21 = vmax.f32 %v589_v18, 0.0  ;;  %2402 = vmatmul.mubr.msk.f32.gmra.mrb[44].mxu1 %vm738_vm2, %v717_v15 }
 0x137   :  { %v718_v22 = vmax.f32 %v584_v20, 0.0  ;;  %v2309_v23 = vpop.f32.mrb[48].mxu0 }
 0x138   :  { %v599_v24 = vadd.f32 %v2309_v23, %v3014_v4  ;;  %v593_v25 = vpop.f32.mrb[49].mxu0 }
 0x139   :  { %v594_v26 = vadd.f32 %v3014_v4, %v593_v25  ;;  %2404 = vmatprep.mubr.msk.f32.mxu1 %vm738_vm2, %v718_v22 }
 0x13a   :  { %v721_v27 = vmax.f32 %v599_v24, 0.0  ;;  %2405 = vmatmul.mubr.msk.f32.gmra.mrb[46].mxu1 %vm738_vm2, %v719_v21 }
 0x13b   :  { %v720_v28 = vmax.f32 %v594_v26, 0.0  ;;  %v2312_v29 = vpop.f32.mrb[50].mxu0 }
 0x13c   :  { %v609_v30 = vadd.f32 %v2312_v29, %v3014_v4  ;;  %v603_v31 = vpop.f32.mrb[51].mxu0 }
 0x13d   :  { %v604_v32 = vadd.f32 %v3014_v4, %v603_v31  ;;  %2407 = vmatprep.mubr.msk.f32.mxu1 %vm738_vm2, %v720_v28 }
 0x13e   :  { %v723_v33 = vmax.f32 %v609_v30, 0.0  ;;  %2408 = vmatmul.mubr.msk.f32.gmra.mrb[48].mxu1 %vm738_vm2, %v721_v27 }
 0x13f   :  { %v722_v34 = vmax.f32 %v604_v32, 0.0  ;;  %v2315_v35 = vpop.f32.mrb[52].mxu0 }
 0x140   :  { %v619_v36 = vadd.f32 %v2315_v35, %v3014_v4  ;;  %v613_v37 = vpop.f32.mrb[53].mxu0 }
 0x141   :  { %v614_v38 = vadd.f32 %v3014_v4, %v613_v37  ;;  %2410 = vmatprep.mubr.msk.f32.mxu1 %vm738_vm2, %v722_v34 }
 0x142   :  { %v725_v39 = vmax.f32 %v619_v36, 0.0  ;;  %2411 = vmatmul.mubr.msk.f32.gmra.mrb[50].mxu1 %vm738_vm2, %v723_v33 }
 0x143   :  { %v724_v40 = vmax.f32 %v614_v38, 0.0  ;;  %v2318_v41 = vpop.f32.mrb[54].mxu0 }
 0x144   :  { %v629_v42 = vadd.f32 %v2318_v41, %v3014_v4  ;;  %v623_v43 = vpop.f32.mrb[55].mxu0 }
 0x145   :  { %v624_v44 = vadd.f32 %v3014_v4, %v623_v43  ;;  %2413 = vmatprep.mubr.msk.f32.mxu1 %vm738_vm2, %v724_v40 }
 0x146   :  { %v727_v45 = vmax.f32 %v629_v42, 0.0  ;;  %2414 = vmatmul.mubr.msk.f32.gmra.mrb[52].mxu1 %vm738_vm2, %v725_v39 }
 0x147   :  { %v726_v46 = vmax.f32 %v624_v44, 0.0  ;;  %v2321_v47 = vpop.f32.mrb[56].mxu0 }
 0x148   :  { %v639_v48 = vadd.f32 %v2321_v47, %v3014_v4  ;;  %v633_v49 = vpop.f32.mrb[57].mxu0 }
 0x149   :  { %v634_v50 = vadd.f32 %v3014_v4, %v633_v49  ;;  %2416 = vmatprep.mubr.msk.f32.mxu1 %vm738_vm2, %v726_v46 }
 0x14a   :  { %v729_v51 = vmax.f32 %v639_v48, 0.0  ;;  %2417 = vmatmul.mubr.msk.f32.gmra.mrb[54].mxu1 %vm738_vm2, %v727_v45 }
 0x14b   :  { %v728_v52 = vmax.f32 %v634_v50, 0.0  ;;  %v2324_v53 = vpop.f32.mrb[58].mxu0 }
 0x14c   :  { %v649_v54 = vadd.f32 %v2324_v53, %v3014_v4  ;;  %v643_v55 = vpop.f32.mrb[59].mxu0 }
 0x14d   :  { %v644_v56 = vadd.f32 %v3014_v4, %v643_v55  ;;  %2419 = vmatprep.mubr.msk.f32.mxu1 %vm738_vm2, %v728_v52 }
 0x14e   :  { %v731_v57 = vmax.f32 %v649_v54, 0.0  ;;  %2420 = vmatmul.mubr.msk.f32.gmra.mrb[56].mxu1 %vm738_vm2, %v729_v51 }
 0x14f   :  { %v730_v58 = vmax.f32 %v644_v56, 0.0  ;;  %v2327_v59 = vpop.f32.mrb[60].mxu0 }
 0x150   :  { %v659_v60 = vadd.f32 %v2327_v59, %v3014_v4  ;;  %v653_v61 = vpop.f32.mrb[61].mxu0 }
 0x151   :  { %v654_v62 = vadd.f32 %v3014_v4, %v653_v61  ;;  %2422 = vmatprep.mubr.msk.f32.mxu1 %vm738_vm2, %v730_v58 }
 0x152   :  { %v733_v63 = vmax.f32 %v659_v60, 0.0  ;;  %2423 = vmatmul.mubr.msk.f32.gmra.mrb[58].mxu1 %vm738_vm2, %v731_v57 }
 0x153   :  { %v732_v0 = vmax.f32 %v654_v62, 0.0  ;;  %v2330_v1 = vpop.f32.mrb[62].mxu0 }
 0x154   :  { %v669_v2 = vadd.f32 %v2330_v1, %v3014_v4  ;;  %v663_v3 = vpop.f32.mrb[63].mxu0 }
 0x155   :  { %v664_v5 = vadd.f32 %v3014_v4, %v663_v3  ;;  %2425 = vmatprep.mubr.msk.f32.mxu1 %vm738_vm2, %v732_v0 }
 0x156   :  { %v735_v6 = vmax.f32 %v669_v2, 0.0  ;;  %2426 = vmatmul.mubr.msk.f32.gmra.mrb[60].mxu1 %vm738_vm2, %v733_v63 }
 0x157   :  { %v734_v7 = vmax.f32 %v664_v5, 0.0 }
 0x159   :  { %2428 = vmatprep.mubr.msk.f32.mxu1 %vm738_vm2, %v734_v7 }
 0x15a   :  { %2429 = vmatmul.mubr.msk.f32.gmra.mrb[62].mxu1 %vm738_vm2, %v735_v6 }
 0x1b1   :  { %v3144_v8 = vpop.f32.mrb[0].mxu1 }
 0x1b2   :  { %1318 = vmax.xlane.f32.xlu0 %v3144_v8  ;;  %v3147_v9 = vpop.f32.mrb[1].mxu1 }
 0x1b5   :  { %v3149_v10 = vpop.f32.mrb[2].mxu1 }
 0x1b6   :  { %1316 = vmax.xlane.f32.xlu0 %v3147_v9  ;;  %1322 = vmax.xlane.f32.xlu1 %v3149_v10  ;;  %v3153_v4 = vpop.f32.mrb[3].mxu1 }
 0x1b9   :  { %v3155_v11 = vpop.f32.mrb[4].mxu1 }
 0x1ba   :  { %1320 = vmax.xlane.f32.xlu1 %v3153_v4  ;;  %v3158_v12 = vpop.f32.mrb[5].mxu1 }
 0x1bb   :  { %1324 = vmax.xlane.f32.xlu0 %v3158_v12 }
 0x1bd   :  { %v3161_v13 = vpop.f32.mrb[6].mxu1 }
 0x1be   :  { %1326 = vmax.xlane.f32.xlu1 %v3155_v11  ;;  %v3164_v14 = vpop.f32.mrb[7].mxu1 }
 0x1bf   :  { %1328 = vmax.xlane.f32.xlu0 %v3164_v14 }
 0x1c1   :  { %v3167_v15 = vpop.f32.mrb[8].mxu1 }
 0x1c2   :  { %1330 = vmax.xlane.f32.xlu1 %v3161_v13  ;;  %v3170_v16 = vpop.f32.mrb[9].mxu1 }
 0x1c3   :  { %1332 = vmax.xlane.f32.xlu0 %v3170_v16 }
 0x1c5   :  { %v3173_v17 = vpop.f32.mrb[10].mxu1 }
 0x1c6   :  { %1334 = vmax.xlane.f32.xlu1 %v3167_v15  ;;  %v3176_v18 = vpop.f32.mrb[11].mxu1 }
 0x1c7   :  { %1336 = vmax.xlane.f32.xlu0 %v3176_v18 }
 0x1c9   :  { %v3179_v19 = vpop.f32.mrb[12].mxu1 }
 0x1ca   :  { %1338 = vmax.xlane.f32.xlu1 %v3173_v17  ;;  %v3182_v20 = vpop.f32.mrb[13].mxu1 }
 0x1cb   :  { %1340 = vmax.xlane.f32.xlu0 %v3182_v20 }
 0x1cd   :  { %v3185_v21 = vpop.f32.mrb[14].mxu1 }
 0x1ce   :  { %1342 = vmax.xlane.f32.xlu1 %v3179_v19  ;;  %v3188_v22 = vpop.f32.mrb[15].mxu1 }
 0x1cf   :  { %1344 = vmax.xlane.f32.xlu0 %v3188_v22 }
 0x1d1   :  { %v3191_v23 = vpop.f32.mrb[16].mxu1 }
 0x1d2   :  { %1346 = vmax.xlane.f32.xlu1 %v3185_v21  ;;  %v3194_v24 = vpop.f32.mrb[17].mxu1 }
 0x1d3   :  { %1348 = vmax.xlane.f32.xlu0 %v3194_v24 }
 0x1d5   :  { %v3197_v25 = vpop.f32.mrb[18].mxu1 }
 0x1d6   :  { %1350 = vmax.xlane.f32.xlu1 %v3191_v23  ;;  %v3200_v26 = vpop.f32.mrb[19].mxu1 }
 0x1d7   :  { %1352 = vmax.xlane.f32.xlu0 %v3200_v26 }
 0x1d9   :  { %v3203_v27 = vpop.f32.mrb[20].mxu1 }
 0x1da   :  { %1354 = vmax.xlane.f32.xlu1 %v3197_v25  ;;  %v3206_v28 = vpop.f32.mrb[21].mxu1 }
 0x1db   :  { %1356 = vmax.xlane.f32.xlu0 %v3206_v28 }
 0x1dd   :  { %v3209_v29 = vpop.f32.mrb[22].mxu1 }
 0x1de   :  { %1358 = vmax.xlane.f32.xlu1 %v3203_v27  ;;  %v3212_v30 = vpop.f32.mrb[23].mxu1 }
 0x1df   :  { %1360 = vmax.xlane.f32.xlu0 %v3212_v30 }
 0x1e1   :  { %v3215_v31 = vpop.f32.mrb[24].mxu1 }
 0x1e2   :  { %1362 = vmax.xlane.f32.xlu1 %v3209_v29  ;;  %v3218_v32 = vpop.f32.mrb[25].mxu1 }
 0x1e3   :  { %1364 = vmax.xlane.f32.xlu0 %v3218_v32 }
 0x1e5   :  { %v3221_v33 = vpop.f32.mrb[26].mxu1 }
 0x1e6   :  { %1366 = vmax.xlane.f32.xlu1 %v3215_v31  ;;  %v3224_v34 = vpop.f32.mrb[27].mxu1 }
 0x1e7   :  { %1368 = vmax.xlane.f32.xlu0 %v3224_v34 }
 0x1e9   :  { %v3227_v35 = vpop.f32.mrb[28].mxu1 }
 0x1ea   :  { %1370 = vmax.xlane.f32.xlu1 %v3221_v33  ;;  %v3230_v36 = vpop.f32.mrb[29].mxu1 }
 0x1eb   :  { %1372 = vmax.xlane.f32.xlu0 %v3230_v36 }
 0x1ed   :  { %v3233_v37 = vpop.f32.mrb[30].mxu1 }
 0x1ee   :  { %1374 = vmax.xlane.f32.xlu1 %v3227_v35  ;;  %v3236_v38 = vpop.f32.mrb[31].mxu1 }
 0x1ef   :  { %1376 = vmax.xlane.f32.xlu0 %v3236_v38 }
 0x1f1   :  { %v3239_v39 = vpop.f32.mrb[32].mxu1 }
 0x1f2   :  { %1378 = vmax.xlane.f32.xlu1 %v3233_v37  ;;  %v3242_v40 = vpop.f32.mrb[33].mxu1 }
 0x1f3   :  { %1380 = vmax.xlane.f32.xlu0 %v3242_v40 }
 0x1f5   :  { %v3245_v41 = vpop.f32.mrb[34].mxu1 }
 0x1f6   :  { %1382 = vmax.xlane.f32.xlu1 %v3239_v39  ;;  %v3248_v42 = vpop.f32.mrb[35].mxu1 }
 0x1f7   :  { %1384 = vmax.xlane.f32.xlu0 %v3248_v42 }
 0x1f9   :  { %v3251_v43 = vpop.f32.mrb[36].mxu1 }
 0x1fa   :  { %1386 = vmax.xlane.f32.xlu1 %v3245_v41  ;;  %v3254_v44 = vpop.f32.mrb[37].mxu1 }
 0x1fb   :  { %1388 = vmax.xlane.f32.xlu0 %v3254_v44 }
 0x1fd   :  { %v3257_v45 = vpop.f32.mrb[38].mxu1 }
 0x1fe   :  { %1390 = vmax.xlane.f32.xlu1 %v3251_v43  ;;  %v3260_v46 = vpop.f32.mrb[39].mxu1 }
 0x1ff   :  { %1392 = vmax.xlane.f32.xlu0 %v3260_v46 }
 0x201   :  { %v3263_v47 = vpop.f32.mrb[40].mxu1 }
 0x202   :  { %1394 = vmax.xlane.f32.xlu1 %v3257_v45  ;;  %v3266_v48 = vpop.f32.mrb[41].mxu1 }
 0x203   :  { %1396 = vmax.xlane.f32.xlu0 %v3266_v48 }
 0x205   :  { %v3269_v49 = vpop.f32.mrb[42].mxu1 }
 0x206   :  { %1398 = vmax.xlane.f32.xlu1 %v3263_v47  ;;  %v3272_v50 = vpop.f32.mrb[43].mxu1 }
 0x207   :  { %1400 = vmax.xlane.f32.xlu0 %v3272_v50 }
 0x209   :  { %v3275_v51 = vpop.f32.mrb[44].mxu1 }
 0x20a   :  { %1402 = vmax.xlane.f32.xlu1 %v3269_v49  ;;  %v3278_v52 = vpop.f32.mrb[45].mxu1 }
 0x20b   :  { %1404 = vmax.xlane.f32.xlu0 %v3278_v52 }
 0x20d   :  { %v3281_v53 = vpop.f32.mrb[46].mxu1 }
 0x20e   :  { %1406 = vmax.xlane.f32.xlu1 %v3275_v51  ;;  %v3284_v54 = vpop.f32.mrb[47].mxu1 }
 0x20f   :  { %1408 = vmax.xlane.f32.xlu0 %v3284_v54 }
 0x211   :  { %v3287_v55 = vpop.f32.mrb[48].mxu1 }
 0x212   :  { %1410 = vmax.xlane.f32.xlu1 %v3281_v53  ;;  %v3290_v56 = vpop.f32.mrb[49].mxu1 }
 0x213   :  { %1412 = vmax.xlane.f32.xlu0 %v3290_v56 }
 0x215   :  { %v3293_v57 = vpop.f32.mrb[50].mxu1 }
 0x216   :  { %3700 = vst [vmem:[#allocation5_spill] sm:$0xff] %v3293_v57  ;;  %1414 = vmax.xlane.f32.xlu1 %v3287_v55  ;;  %v3296_v58 = vpop.f32.mrb[51].mxu1 }
 0x217   :  { %3701 = vst [vmem:[#allocation6_spill] sm:$0xff] %v3296_v58  ;;  %1416 = vmax.xlane.f32.xlu0 %v3296_v58 }
 0x219   :  { %v3299_v59 = vpop.f32.mrb[52].mxu1 }
 0x21a   :  { %3702 = vst [vmem:[#allocation7_spill] sm:$0xff] %v3299_v59  ;;  %1418 = vmax.xlane.f32.xlu1 %v3293_v57  ;;  %v3302_v60 = vpop.f32.mrb[53].mxu1 }
 0x21b   :  { %3703 = vst [vmem:[#allocation8_spill] sm:$0xff] %v3302_v60  ;;  %1420 = vmax.xlane.f32.xlu0 %v3302_v60 }
 0x21d   :  { %v3305_v61 = vpop.f32.mrb[54].mxu1 }
 0x21e   :  { %3704 = vst [vmem:[#allocation9_spill] sm:$0xff] %v3305_v61  ;;  %1422 = vmax.xlane.f32.xlu1 %v3299_v59  ;;  %v3308_v62 = vpop.f32.mrb[55].mxu1 }
 0x21f   :  { %3705 = vst [vmem:[#allocation10_spill] sm:$0xff] %v3308_v62  ;;  %1424 = vmax.xlane.f32.xlu0 %v3308_v62 }
 0x221   :  { %v3311_v63 = vpop.f32.mrb[56].mxu1 }
 0x222   :  { %3706 = vst [vmem:[#allocation11_spill] sm:$0xff] %v3311_v63  ;;  %1426 = vmax.xlane.f32.xlu1 %v3305_v61  ;;  %v3314_v0 = vpop.f32.mrb[57].mxu1 }
 0x223   :  { %3707 = vst [vmem:[#allocation12_spill] sm:$0xff] %v3314_v0  ;;  %1428 = vmax.xlane.f32.xlu0 %v3314_v0 }
 0x225   :  { %v3317_v1 = vpop.f32.mrb[58].mxu1 }
 0x226   :  { %3708 = vst [vmem:[#allocation13_spill] sm:$0xff] %v3317_v1  ;;  %1430 = vmax.xlane.f32.xlu1 %v3311_v63  ;;  %v3320_v2 = vpop.f32.mrb[59].mxu1 }
 0x227   :  { %3709 = vst [vmem:[#allocation14_spill] sm:$0xff] %v3320_v2  ;;  %1432 = vmax.xlane.f32.xlu0 %v3320_v2 }
 0x229   :  { %v3323_v3 = vpop.f32.mrb[60].mxu1 }
 0x22a   :  { %3710 = vst [vmem:[#allocation15_spill] sm:$0xff] %v3323_v3  ;;  %1434 = vmax.xlane.f32.xlu1 %v3317_v1  ;;  %v3326_v5 = vpop.f32.mrb[61].mxu1 }
 0x22b   :  { %3711 = vst [vmem:[#allocation16_spill] sm:$0xff] %v3326_v5  ;;  %1436 = vmax.xlane.f32.xlu0 %v3326_v5 }
 0x22d   :  { %v3329_v6 = vpop.f32.mrb[62].mxu1 }
 0x22e   :  { %3712 = vst [vmem:[#allocation17_spill] sm:$0xff] %v3329_v6  ;;  %1438 = vmax.xlane.f32.xlu1 %v3323_v3  ;;  %v3332_v7 = vpop.f32.mrb[63].mxu1 }
 0x22f   :  { %3713 = vst [vmem:[#allocation18_spill] sm:$0xff] %v3332_v7  ;;  %1440 = vmax.xlane.f32.xlu0 %v3332_v7 }
 0x232   :  { %1442 = vmax.xlane.f32.xlu1 %v3329_v6 }
 0x23f   :  { %v1319_v63 = vpop.xlane.xlu0 %1318 }
 0x240   :  { %v1445_v2 = vsub.f32 %v3144_v8, %v1319_v63 }
 0x242   :  { %v1510_v0 = vmul.f32 1.442695, %v1445_v2 }
 0x243   :  { %v1317_v61 = vpop.xlane.xlu0 %1316  ;;  %v1323_v1 = vpop.xlane.xlu1 %1322 }
 0x244   :  { %2438 = vpow2.f32 %v1510_v0  ;;  %v1444_v62 = vsub.f32 %v3147_v9, %v1317_v61  ;;  %v1447_v5 = vsub.f32 %v3149_v10, %v1323_v1 }
 0x246   :  { %v1508_v59 = vmul.f32 1.442695, %v1444_v62  ;;  %v1514_v60 = vmul.f32 1.442695, %v1447_v5 }
 0x247   :  { %v1321_v3 = vpop.xlane.xlu1 %1320 }
 0x248   :  { %2440 = vpow2.f32 %v1508_v59  ;;  %v1446_v57 = vsub.f32 %v3153_v4, %v1321_v3  ;;  %v1325_v7 = vpop.xlane.xlu0 %1324 }
 0x249   :  { %2442 = vpow2.f32 %v1514_v60  ;;  %v1448_v6 = vsub.f32 %v3158_v12, %v1325_v7 }
 0x24a   :  { %v1512_v58 = vmul.f32 1.442695, %v1446_v57 }
 0x24b   :  { %v1516_v8 = vmul.f32 1.442695, %v1448_v6  ;;  %v1327_v63 = vpop.xlane.xlu1 %1326 }
 0x24c   :  { %2444 = vpow2.f32 %v1512_v58  ;;  %v1449_v0 = vsub.f32 %v3155_v11, %v1327_v63  ;;  %v1329_v2 = vpop.xlane.xlu0 %1328 }
 0x24d   :  { %v1450_v9 = vsub.f32 %v3164_v14, %v1329_v2  ;;  %2446 = vpow2.f32 %v1516_v8 }
 0x24e   :  { %v3343_v10 = vpop.eup %2438  ;;  %v1518_v61 = vmul.f32 1.442695, %v1449_v0 }
 0x24f   :  { %v1520_v59 = vmul.f32 1.442695, %v1450_v9  ;;  %v1331_v62 = vpop.xlane.xlu1 %1330  ;;  %1638 = vadd.xlane.f32.xlu1 %v3343_v10 }
 0x250   :  { %2448 = vpow2.f32 %v1518_v61  ;;  %v1451_v4 = vsub.f32 %v3161_v13, %v1331_v62  ;;  %v1333_v12 = vpop.xlane.xlu0 %1332 }
 0x251   :  { %v1452_v57 = vsub.f32 %v3170_v16, %v1333_v12  ;;  %2450 = vpow2.f32 %v1520_v59 }
 0x252   :  { %v3348_v58 = vpop.eup %2440  ;;  %v1522_v11 = vmul.f32 1.442695, %v1451_v4 }
 0x253   :  { %v3350_v60 = vpop.eup %2442  ;;  %v1524_v14 = vmul.f32 1.442695, %v1452_v57  ;;  %v1335_v1 = vpop.xlane.xlu1 %1334  ;;  %1636 = vadd.xlane.f32.xlu0 %v3348_v58 }
 0x254   :  { %2452 = vpow2.f32 %v1522_v11  ;;  %v1453_v3 = vsub.f32 %v3167_v15, %v1335_v1  ;;  %1642 = vadd.xlane.f32.xlu1 %v3350_v60  ;;  %v1337_v5 = vpop.xlane.xlu0 %1336 }
 0x255   :  { %v1454_v13 = vsub.f32 %v3176_v18, %v1337_v5  ;;  %2454 = vpow2.f32 %v1524_v14 }
 0x256   :  { %v3356_v6 = vpop.eup %2444  ;;  %v1526_v16 = vmul.f32 1.442695, %v1453_v3 }
 0x257   :  { %v1528_v7 = vmul.f32 1.442695, %v1454_v13  ;;  %v1339_v8 = vpop.xlane.xlu1 %1338  ;;  %1640 = vadd.xlane.f32.xlu0 %v3356_v6  ;;  %v3360_v2 = vpop.eup %2446 }
 0x258   :  { %2456 = vpow2.f32 %v1526_v16  ;;  %v1455_v63 = vsub.f32 %v3173_v17, %v1339_v8  ;;  %v1341_v0 = vpop.xlane.xlu0 %1340 }
 0x259   :  { %v1456_v15 = vsub.f32 %v3182_v20, %v1341_v0  ;;  %2458 = vpow2.f32 %v1528_v7 }
 0x25a   :  { %v3363_v9 = vpop.eup %2448  ;;  %v1530_v61 = vmul.f32 1.442695, %v1455_v63 }
 0x25b   :  { %v1532_v18 = vmul.f32 1.442695, %v1456_v15  ;;  %v1343_v59 = vpop.xlane.xlu1 %1342  ;;  %1646 = vadd.xlane.f32.xlu1 %v3363_v9  ;;  %1644 = vadd.xlane.f32.xlu0 %v3360_v2  ;;  %v3368_v17 = vpop.eup %2450 }
 0x25c   :  { %2460 = vpow2.f32 %v1530_v61  ;;  %v1457_v62 = vsub.f32 %v3179_v19, %v1343_v59  ;;  %v1345_v4 = vpop.xlane.xlu0 %1344 }
 0x25d   :  { %v1458_v12 = vsub.f32 %v3188_v22, %v1345_v4  ;;  %2462 = vpow2.f32 %v1532_v18 }
 0x25e   :  { %v3371_v57 = vpop.eup %2452  ;;  %v1534_v20 = vmul.f32 1.442695, %v1457_v62 }
 0x25f   :  { %v1536_v11 = vmul.f32 1.442695, %v1458_v12  ;;  %v1347_v14 = vpop.xlane.xlu1 %1346  ;;  %1650 = vadd.xlane.f32.xlu1 %v3371_v57  ;;  %1648 = vadd.xlane.f32.xlu0 %v3368_v17  ;;  %v3376_v19 = vpop.eup %2454 }
 0x260   :  { %2464 = vpow2.f32 %v1534_v20  ;;  %v1459_v1 = vsub.f32 %v3185_v21, %v1347_v14  ;;  %v1349_v3 = vpop.xlane.xlu0 %1348 }
 0x261   :  { %v1460_v5 = vsub.f32 %v3194_v24, %v1349_v3  ;;  %2466 = vpow2.f32 %v1536_v11 }
 0x262   :  { %v3379_v13 = vpop.eup %2456  ;;  %v1538_v22 = vmul.f32 1.442695, %v1459_v1 }
 0x263   :  { %v1540_v16 = vmul.f32 1.442695, %v1460_v5  ;;  %v1351_v7 = vpop.xlane.xlu1 %1350  ;;  %1654 = vadd.xlane.f32.xlu1 %v3379_v13  ;;  %1652 = vadd.xlane.f32.xlu0 %v3376_v19  ;;  %v3384_v21 = vpop.eup %2458 }
 0x264   :  { %2468 = vpow2.f32 %v1538_v22  ;;  %v1461_v8 = vsub.f32 %v3191_v23, %v1351_v7  ;;  %v1353_v63 = vpop.xlane.xlu0 %1352 }
 0x265   :  { %v1462_v0 = vsub.f32 %v3200_v26, %v1353_v63  ;;  %2470 = vpow2.f32 %v1540_v16 }
 0x266   :  { %v3387_v15 = vpop.eup %2460  ;;  %v1542_v24 = vmul.f32 1.442695, %v1461_v8 }
 0x267   :  { %v1544_v61 = vmul.f32 1.442695, %v1462_v0  ;;  %v1355_v18 = vpop.xlane.xlu1 %1354  ;;  %1658 = vadd.xlane.f32.xlu1 %v3387_v15  ;;  %1656 = vadd.xlane.f32.xlu0 %v3384_v21  ;;  %v3392_v23 = vpop.eup %2462 }
 0x268   :  { %2472 = vpow2.f32 %v1542_v24  ;;  %v1463_v59 = vsub.f32 %v3197_v25, %v1355_v18  ;;  %v1357_v62 = vpop.xlane.xlu0 %1356 }
 0x269   :  { %v1464_v4 = vsub.f32 %v3206_v28, %v1357_v62  ;;  %2474 = vpow2.f32 %v1544_v61 }
 0x26a   :  { %v3395_v12 = vpop.eup %2464  ;;  %v1546_v26 = vmul.f32 1.442695, %v1463_v59 }
 0x26b   :  { %v1548_v20 = vmul.f32 1.442695, %v1464_v4  ;;  %v1359_v11 = vpop.xlane.xlu1 %1358  ;;  %1662 = vadd.xlane.f32.xlu1 %v3395_v12  ;;  %1660 = vadd.xlane.f32.xlu0 %v3392_v23  ;;  %v3400_v25 = vpop.eup %2466 }
 0x26c   :  { %2476 = vpow2.f32 %v1546_v26  ;;  %v1465_v14 = vsub.f32 %v3203_v27, %v1359_v11  ;;  %v1361_v1 = vpop.xlane.xlu0 %1360 }
 0x26d   :  { %v1466_v3 = vsub.f32 %v3212_v30, %v1361_v1  ;;  %2478 = vpow2.f32 %v1548_v20 }
 0x26e   :  { %v3403_v5 = vpop.eup %2468  ;;  %v1550_v28 = vmul.f32 1.442695, %v1465_v14 }
 0x26f   :  { %v1552_v22 = vmul.f32 1.442695, %v1466_v3  ;;  %v1363_v16 = vpop.xlane.xlu1 %1362  ;;  %1666 = vadd.xlane.f32.xlu1 %v3403_v5  ;;  %1664 = vadd.xlane.f32.xlu0 %v3400_v25  ;;  %v3408_v27 = vpop.eup %2470 }
 0x270   :  { %2480 = vpow2.f32 %v1550_v28  ;;  %v1467_v7 = vsub.f32 %v3209_v29, %v1363_v16  ;;  %v1365_v8 = vpop.xlane.xlu0 %1364 }
 0x271   :  { %v1468_v63 = vsub.f32 %v3218_v32, %v1365_v8  ;;  %2482 = vpow2.f32 %v1552_v22 }
 0x272   :  { %v3411_v0 = vpop.eup %2472  ;;  %v1554_v30 = vmul.f32 1.442695, %v1467_v7 }
 0x273   :  { %v1556_v24 = vmul.f32 1.442695, %v1468_v63  ;;  %v1367_v61 = vpop.xlane.xlu1 %1366  ;;  %1670 = vadd.xlane.f32.xlu1 %v3411_v0  ;;  %1668 = vadd.xlane.f32.xlu0 %v3408_v27  ;;  %v3416_v29 = vpop.eup %2474 }
 0x274   :  { %2484 = vpow2.f32 %v1554_v30  ;;  %v1469_v18 = vsub.f32 %v3215_v31, %v1367_v61  ;;  %v1369_v59 = vpop.xlane.xlu0 %1368 }
 0x275   :  { %v1470_v62 = vsub.f32 %v3224_v34, %v1369_v59  ;;  %2486 = vpow2.f32 %v1556_v24 }
 0x276   :  { %v3419_v4 = vpop.eup %2476  ;;  %v1558_v32 = vmul.f32 1.442695, %v1469_v18 }
 0x277   :  { %v1560_v26 = vmul.f32 1.442695, %v1470_v62  ;;  %v1371_v20 = vpop.xlane.xlu1 %1370  ;;  %1674 = vadd.xlane.f32.xlu1 %v3419_v4  ;;  %1672 = vadd.xlane.f32.xlu0 %v3416_v29  ;;  %v3424_v31 = vpop.eup %2478 }
 0x278   :  { %2488 = vpow2.f32 %v1558_v32  ;;  %v1471_v11 = vsub.f32 %v3221_v33, %v1371_v20  ;;  %v1373_v14 = vpop.xlane.xlu0 %1372 }
 0x279   :  { %v1472_v1 = vsub.f32 %v3230_v36, %v1373_v14  ;;  %2490 = vpow2.f32 %v1560_v26 }
 0x27a   :  { %v3427_v3 = vpop.eup %2480  ;;  %v1562_v34 = vmul.f32 1.442695, %v1471_v11 }
 0x27b   :  { %v1564_v28 = vmul.f32 1.442695, %v1472_v1  ;;  %v1375_v22 = vpop.xlane.xlu1 %1374  ;;  %1678 = vadd.xlane.f32.xlu1 %v3427_v3  ;;  %1676 = vadd.xlane.f32.xlu0 %v3424_v31  ;;  %v3432_v33 = vpop.eup %2482 }
 0x27c   :  { %2492 = vpow2.f32 %v1562_v34  ;;  %v1473_v16 = vsub.f32 %v3227_v35, %v1375_v22  ;;  %v1377_v7 = vpop.xlane.xlu0 %1376 }
 0x27d   :  { %v1474_v8 = vsub.f32 %v3236_v38, %v1377_v7  ;;  %2494 = vpow2.f32 %v1564_v28 }
 0x27e   :  { %v3435_v63 = vpop.eup %2484  ;;  %v1566_v36 = vmul.f32 1.442695, %v1473_v16 }
 0x27f   :  { %v1568_v30 = vmul.f32 1.442695, %v1474_v8  ;;  %v1379_v24 = vpop.xlane.xlu1 %1378  ;;  %1682 = vadd.xlane.f32.xlu1 %v3435_v63  ;;  %1680 = vadd.xlane.f32.xlu0 %v3432_v33  ;;  %v3440_v35 = vpop.eup %2486 }
 0x280   :  { %2496 = vpow2.f32 %v1566_v36  ;;  %v1475_v61 = vsub.f32 %v3233_v37, %v1379_v24  ;;  %v1381_v18 = vpop.xlane.xlu0 %1380 }
 0x281   :  { %v1476_v59 = vsub.f32 %v3242_v40, %v1381_v18  ;;  %2498 = vpow2.f32 %v1568_v30 }
 0x282   :  { %v3443_v62 = vpop.eup %2488  ;;  %v1570_v38 = vmul.f32 1.442695, %v1475_v61 }
 0x283   :  { %v1572_v32 = vmul.f32 1.442695, %v1476_v59  ;;  %v1383_v26 = vpop.xlane.xlu1 %1382  ;;  %1686 = vadd.xlane.f32.xlu1 %v3443_v62  ;;  %1684 = vadd.xlane.f32.xlu0 %v3440_v35  ;;  %v3448_v37 = vpop.eup %2490 }
 0x284   :  { %2500 = vpow2.f32 %v1570_v38  ;;  %v1477_v20 = vsub.f32 %v3239_v39, %v1383_v26  ;;  %v1385_v11 = vpop.xlane.xlu0 %1384 }
 0x285   :  { %v1478_v14 = vsub.f32 %v3248_v42, %v1385_v11  ;;  %2502 = vpow2.f32 %v1572_v32 }
 0x286   :  { %v3451_v1 = vpop.eup %2492  ;;  %v1574_v40 = vmul.f32 1.442695, %v1477_v20 }
 0x287   :  { %v1576_v34 = vmul.f32 1.442695, %v1478_v14  ;;  %v1387_v28 = vpop.xlane.xlu1 %1386  ;;  %1690 = vadd.xlane.f32.xlu1 %v3451_v1  ;;  %1688 = vadd.xlane.f32.xlu0 %v3448_v37  ;;  %v3456_v39 = vpop.eup %2494 }
 0x288   :  { %2504 = vpow2.f32 %v1574_v40  ;;  %v1479_v22 = vsub.f32 %v3245_v41, %v1387_v28  ;;  %v1389_v16 = vpop.xlane.xlu0 %1388 }
 0x289   :  { %v1480_v7 = vsub.f32 %v3254_v44, %v1389_v16  ;;  %2506 = vpow2.f32 %v1576_v34 }
 0x28a   :  { %v3459_v8 = vpop.eup %2496  ;;  %v1578_v42 = vmul.f32 1.442695, %v1479_v22 }
 0x28b   :  { %v1580_v36 = vmul.f32 1.442695, %v1480_v7  ;;  %v1391_v30 = vpop.xlane.xlu1 %1390  ;;  %1694 = vadd.xlane.f32.xlu1 %v3459_v8  ;;  %1692 = vadd.xlane.f32.xlu0 %v3456_v39  ;;  %v3464_v41 = vpop.eup %2498 }
 0x28c   :  { %2508 = vpow2.f32 %v1578_v42  ;;  %v1481_v24 = vsub.f32 %v3251_v43, %v1391_v30  ;;  %v1393_v61 = vpop.xlane.xlu0 %1392 }
 0x28d   :  { %v1482_v18 = vsub.f32 %v3260_v46, %v1393_v61  ;;  %2510 = vpow2.f32 %v1580_v36 }
 0x28e   :  { %v3467_v59 = vpop.eup %2500  ;;  %v1582_v44 = vmul.f32 1.442695, %v1481_v24 }
 0x28f   :  { %v1584_v38 = vmul.f32 1.442695, %v1482_v18  ;;  %v1395_v32 = vpop.xlane.xlu1 %1394  ;;  %1698 = vadd.xlane.f32.xlu1 %v3467_v59  ;;  %1696 = vadd.xlane.f32.xlu0 %v3464_v41  ;;  %v3472_v43 = vpop.eup %2502 }
 0x290   :  { %2512 = vpow2.f32 %v1582_v44  ;;  %v1483_v26 = vsub.f32 %v3257_v45, %v1395_v32  ;;  %v1397_v20 = vpop.xlane.xlu0 %1396 }
 0x291   :  { %v1484_v11 = vsub.f32 %v3266_v48, %v1397_v20  ;;  %2514 = vpow2.f32 %v1584_v38 }
 0x292   :  { %v3475_v14 = vpop.eup %2504  ;;  %v1586_v46 = vmul.f32 1.442695, %v1483_v26 }
 0x293   :  { %v1588_v40 = vmul.f32 1.442695, %v1484_v11  ;;  %v1399_v34 = vpop.xlane.xlu1 %1398  ;;  %1702 = vadd.xlane.f32.xlu1 %v3475_v14  ;;  %1700 = vadd.xlane.f32.xlu0 %v3472_v43  ;;  %v3480_v45 = vpop.eup %2506 }
 0x294   :  { %2516 = vpow2.f32 %v1586_v46  ;;  %v1485_v28 = vsub.f32 %v3263_v47, %v1399_v34  ;;  %v1401_v22 = vpop.xlane.xlu0 %1400 }
 0x295   :  { %v1486_v16 = vsub.f32 %v3272_v50, %v1401_v22  ;;  %2518 = vpow2.f32 %v1588_v40 }
 0x296   :  { %v3483_v7 = vpop.eup %2508  ;;  %v1590_v48 = vmul.f32 1.442695, %v1485_v28 }
 0x297   :  { %v1592_v42 = vmul.f32 1.442695, %v1486_v16  ;;  %v1403_v36 = vpop.xlane.xlu1 %1402  ;;  %1706 = vadd.xlane.f32.xlu1 %v3483_v7  ;;  %1704 = vadd.xlane.f32.xlu0 %v3480_v45  ;;  %v3488_v47 = vpop.eup %2510 }
 0x298   :  { %2520 = vpow2.f32 %v1590_v48  ;;  %v1487_v30 = vsub.f32 %v3269_v49, %v1403_v36  ;;  %v1405_v24 = vpop.xlane.xlu0 %1404 }
 0x299   :  { %v1488_v61 = vsub.f32 %v3278_v52, %v1405_v24  ;;  %2522 = vpow2.f32 %v1592_v42  ;;  %v3714_v24 = vld [vmem:[#allocation6_spill] sm:$0xff] }
 0x29a   :  { %v3491_v18 = vpop.eup %2512  ;;  %v1594_v50 = vmul.f32 1.442695, %v1487_v30 }
 0x29b   :  { %v1596_v44 = vmul.f32 1.442695, %v1488_v61  ;;  %v1407_v38 = vpop.xlane.xlu1 %1406  ;;  %1710 = vadd.xlane.f32.xlu1 %v3491_v18  ;;  %1708 = vadd.xlane.f32.xlu0 %v3488_v47  ;;  %v3496_v49 = vpop.eup %2514 }
 0x29c   :  { %2524 = vpow2.f32 %v1594_v50  ;;  %v1489_v32 = vsub.f32 %v3275_v51, %v1407_v38  ;;  %v1409_v26 = vpop.xlane.xlu0 %1408 }
 0x29d   :  { %v1490_v20 = vsub.f32 %v3284_v54, %v1409_v26  ;;  %2526 = vpow2.f32 %v1596_v44 }
 0x29e   :  { %v3499_v11 = vpop.eup %2516  ;;  %v1598_v52 = vmul.f32 1.442695, %v1489_v32  ;;  %v3715_v32 = vld [vmem:[#allocation5_spill] sm:$0xff] }
 0x29f   :  { %v1600_v46 = vmul.f32 1.442695, %v1490_v20  ;;  %v1411_v40 = vpop.xlane.xlu1 %1410  ;;  %1714 = vadd.xlane.f32.xlu1 %v3499_v11  ;;  %1712 = vadd.xlane.f32.xlu0 %v3496_v49  ;;  %v3504_v51 = vpop.eup %2518 }
 0x2a0   :  { %2528 = vpow2.f32 %v1598_v52  ;;  %v1491_v34 = vsub.f32 %v3281_v53, %v1411_v40  ;;  %v1413_v28 = vpop.xlane.xlu0 %1412  ;;  %v3716_v52 = vld [vmem:[#allocation8_spill] sm:$0xff] }
 0x2a1   :  { %v1492_v22 = vsub.f32 %v3290_v56, %v1413_v28  ;;  %2530 = vpow2.f32 %v1600_v46 }
 0x2a2   :  { %v3507_v16 = vpop.eup %2520  ;;  %v1602_v54 = vmul.f32 1.442695, %v1491_v34 }
 0x2a3   :  { %v1604_v48 = vmul.f32 1.442695, %v1492_v22  ;;  %v1415_v42 = vpop.xlane.xlu1 %1414  ;;  %1718 = vadd.xlane.f32.xlu1 %v3507_v16  ;;  %1716 = vadd.xlane.f32.xlu0 %v3504_v51  ;;  %v3512_v53 = vpop.eup %2522 }
 0x2a4   :  { %2532 = vpow2.f32 %v1602_v54  ;;  %v1493_v36 = vsub.f32 %v3287_v55, %v1415_v42  ;;  %v1417_v30 = vpop.xlane.xlu0 %1416  ;;  %v3717_v54 = vld [vmem:[#allocation7_spill] sm:$0xff] }
 0x2a5   :  { %v1494_v61 = vsub.f32 %v3714_v24, %v1417_v30  ;;  %2534 = vpow2.f32 %v1604_v48  ;;  %v3719_v30 = vld [vmem:[#allocation10_spill] sm:$0xff] }
 0x2a6   :  { %v3515_v50 = vpop.eup %2524  ;;  %v1606_v56 = vmul.f32 1.442695, %v1493_v36 }
 0x2a7   :  { %v1608_v44 = vmul.f32 1.442695, %v1494_v61  ;;  %v1419_v38 = vpop.xlane.xlu1 %1418  ;;  %1722 = vadd.xlane.f32.xlu1 %v3515_v50  ;;  %1720 = vadd.xlane.f32.xlu0 %v3512_v53  ;;  %v3520_v55 = vpop.eup %2526 }
 0x2a8   :  { %2536 = vpow2.f32 %v1606_v56  ;;  %v1495_v26 = vsub.f32 %v3715_v32, %v1419_v38  ;;  %v1421_v20 = vpop.xlane.xlu0 %1420  ;;  %v3720_v32 = vld [vmem:[#allocation9_spill] sm:$0xff] }
 0x2a9   :  { %v1496_v46 = vsub.f32 %v3716_v52, %v1421_v20  ;;  %2538 = vpow2.f32 %v1608_v44 }
 0x2aa   :  { %v3523_v40 = vpop.eup %2528  ;;  %v1610_v34 = vmul.f32 1.442695, %v1495_v26 }
 0x2ab   :  { %v1612_v28 = vmul.f32 1.442695, %v1496_v46  ;;  %v1423_v22 = vpop.xlane.xlu1 %1422  ;;  %1726 = vadd.xlane.f32.xlu1 %v3523_v40  ;;  %1724 = vadd.xlane.f32.xlu0 %v3520_v55  ;;  %v3528_v36 = vpop.eup %2530  ;;  %v3722_v46 = vld [vmem:[#allocation12_spill] sm:$0xff] }
 0x2ac   :  { %2540 = vpow2.f32 %v1610_v34  ;;  %v1497_v48 = vsub.f32 %v3717_v54, %v1423_v22  ;;  %v1425_v42 = vpop.xlane.xlu0 %1424  ;;  %3718 = vst [vmem:[#allocation6_spill] sm:$0xff] %v3528_v36 }
 0x2ad   :  { %v1498_v24 = vsub.f32 %v3719_v30, %v1425_v42  ;;  %2542 = vpow2.f32 %v1612_v28  ;;  %v3724_v42 = vld [vmem:[#allocation11_spill] sm:$0xff] }
 0x2ae   :  { %v3531_v61 = vpop.eup %2532  ;;  %v1614_v56 = vmul.f32 1.442695, %v1497_v48 }
 0x2af   :  { %v1616_v38 = vmul.f32 1.442695, %v1498_v24  ;;  %v1427_v44 = vpop.xlane.xlu1 %1426  ;;  %1730 = vadd.xlane.f32.xlu1 %v3531_v61  ;;  %1728 = vadd.xlane.f32.xlu0 %v3528_v36  ;;  %v3536_v52 = vpop.eup %2534 }
 0x2b0   :  { %2544 = vpow2.f32 %v1614_v56  ;;  %v1499_v26 = vsub.f32 %v3720_v32, %v1427_v44  ;;  %v1429_v20 = vpop.xlane.xlu0 %1428  ;;  %3721 = vst [vmem:[#allocation5_spill] sm:$0xff] %v3536_v52  ;;  %v3726_v44 = vld [vmem:[#allocation14_spill] sm:$0xff] }
 0x2b1   :  { %v1500_v34 = vsub.f32 %v3722_v46, %v1429_v20  ;;  %2546 = vpow2.f32 %v1616_v38  ;;  %v3728_v46 = vld [vmem:[#allocation13_spill] sm:$0xff] }
 0x2b2   :  { %v3539_v22 = vpop.eup %2536  ;;  %v1618_v54 = vmul.f32 1.442695, %v1499_v26 }
 0x2b3   :  { %3723 = vst [vmem:[#allocation8_spill] sm:$0xff] %v3539_v22  ;;  %v1620_v48 = vmul.f32 1.442695, %v1500_v34  ;;  %v1431_v28 = vpop.xlane.xlu1 %1430  ;;  %1734 = vadd.xlane.f32.xlu1 %v3539_v22  ;;  %1732 = vadd.xlane.f32.xlu0 %v3536_v52  ;;  %v3544_v56 = vpop.eup %2538 }
 0x2b4   :  { %2548 = vpow2.f32 %v1618_v54  ;;  %v1501_v30 = vsub.f32 %v3724_v42, %v1431_v28  ;;  %v1433_v24 = vpop.xlane.xlu0 %1432  ;;  %3725 = vst [vmem:[#allocation7_spill] sm:$0xff] %v3544_v56  ;;  %v3729_v42 = vld [vmem:[#allocation16_spill] sm:$0xff] }
 0x2b5   :  { %v1502_v32 = vsub.f32 %v3726_v44, %v1433_v24  ;;  %2550 = vpow2.f32 %v1620_v48  ;;  %v3730_v44 = vld [vmem:[#allocation15_spill] sm:$0xff] }
 0x2b6   :  { %v3547_v36 = vpop.eup %2540  ;;  %v1622_v20 = vmul.f32 1.442695, %v1501_v30 }
 0x2b7   :  { %3727 = vst [vmem:[#allocation10_spill] sm:$0xff] %v3547_v36  ;;  %v1624_v26 = vmul.f32 1.442695, %v1502_v32  ;;  %v1435_v38 = vpop.xlane.xlu1 %1434  ;;  %1738 = vadd.xlane.f32.xlu1 %v3547_v36  ;;  %1736 = vadd.xlane.f32.xlu0 %v3544_v56  ;;  %v3552_v28 = vpop.eup %2542 }
 0x2b8   :  { %2552 = vpow2.f32 %v1622_v20  ;;  %v1503_v34 = vsub.f32 %v3728_v46, %v1435_v38  ;;  %v1437_v54 = vpop.xlane.xlu0 %1436  ;;  %v3731_v46 = vld [vmem:[#allocation18_spill] sm:$0xff] }
 0x2b9   :  { %v1504_v52 = vsub.f32 %v3729_v42, %v1437_v54  ;;  %2554 = vpow2.f32 %v1624_v26  ;;  %v3732_v26 = vld [vmem:[#allocation17_spill] sm:$0xff] }
 0x2ba   :  { %v3555_v22 = vpop.eup %2544  ;;  %v1626_v24 = vmul.f32 1.442695, %v1503_v34 }
 0x2bb   :  { %v1628_v30 = vmul.f32 1.442695, %v1504_v52  ;;  %v1439_v48 = vpop.xlane.xlu1 %1438  ;;  %1742 = vadd.xlane.f32.xlu1 %v3555_v22  ;;  %1740 = vadd.xlane.f32.xlu0 %v3552_v28  ;;  %v3560_v38 = vpop.eup %2546 }
 0x2bc   :  { %2556 = vpow2.f32 %v1626_v24  ;;  %v1505_v32 = vsub.f32 %v3730_v44, %v1439_v48  ;;  %v1441_v20 = vpop.xlane.xlu0 %1440 }
 0x2bd   :  { %v1506_v56 = vsub.f32 %v3731_v46, %v1441_v20  ;;  %2558 = vpow2.f32 %v1628_v30 }
 0x2be   :  { %v3563_v36 = vpop.eup %2548  ;;  %v1630_v54 = vmul.f32 1.442695, %v1505_v32 }
 0x2bf   :  { %v1632_v34 = vmul.f32 1.442695, %v1506_v56  ;;  %1746 = vadd.xlane.f32.xlu1 %v3563_v36  ;;  %v1443_v52 = vpop.xlane.xlu1 %1442  ;;  %1744 = vadd.xlane.f32.xlu0 %v3560_v38  ;;  %v3568_v24 = vpop.eup %2550 }
 0x2c0   :  { %2560 = vpow2.f32 %v1630_v54  ;;  %v1507_v42 = vsub.f32 %v3732_v26, %v1443_v52  ;;  %3733 = vst [vmem:[#allocation9_spill] sm:$0xff] %v3568_v24 }
 0x2c1   :  { %2562 = vpow2.f32 %v1632_v34 }
 0x2c2   :  { %v3570_v48 = vpop.eup %2552  ;;  %v1634_v44 = vmul.f32 1.442695, %v1507_v42 }
 0x2c3   :  { %3734 = vst [vmem:[#allocation12_spill] sm:$0xff] %v3570_v48  ;;  %1750 = vadd.xlane.f32.xlu1 %v3570_v48  ;;  %1748 = vadd.xlane.f32.xlu0 %v3568_v24  ;;  %v3574_v56 = vpop.eup %2554 }
 0x2c4   :  { %2564 = vpow2.f32 %v1634_v44  ;;  %3735 = vst [vmem:[#allocation11_spill] sm:$0xff] %v3574_v56 }
 0x2c6   :  { %v3576_v30 = vpop.eup %2556 }
 0x2c7   :  { %3736 = vst [vmem:[#allocation14_spill] sm:$0xff] %v3576_v30  ;;  %1754 = vadd.xlane.f32.xlu1 %v3576_v30  ;;  %1752 = vadd.xlane.f32.xlu0 %v3574_v56  ;;  %v3580_v32 = vpop.eup %2558 }
 0x2c8   :  { %3737 = vst [vmem:[#allocation13_spill] sm:$0xff] %v3580_v32 }
 0x2ca   :  { %v3582_v20 = vpop.eup %2560 }
 0x2cb   :  { %3738 = vst [vmem:[#allocation16_spill] sm:$0xff] %v3582_v20  ;;  %1758 = vadd.xlane.f32.xlu1 %v3582_v20  ;;  %1756 = vadd.xlane.f32.xlu0 %v3580_v32  ;;  %v3586_v46 = vpop.eup %2562 }
 0x2cc   :  { %3739 = vst [vmem:[#allocation15_spill] sm:$0xff] %v3586_v46 }
 0x2ce   :  { %v3588_v54 = vpop.eup %2564 }
 0x2cf   :  { %3740 = vst [vmem:[#allocation18_spill] sm:$0xff] %v3588_v54  ;;  %1762 = vadd.xlane.f32.xlu1 %v3588_v54  ;;  %1760 = vadd.xlane.f32.xlu0 %v3586_v46 }
 0x2dc   :  { %v1639_v34 = vpop.xlane.xlu1 %1638 }
 0x2dd   :  { %2566 = vrcp.f32 %v1639_v34 }
 0x2e0   :  { %v1637_v52 = vpop.xlane.xlu0 %1636 }
 0x2e1   :  { %v1643_v26 = vpop.xlane.xlu1 %1642  ;;  %2568 = vrcp.f32 %v1637_v52 }
 0x2e2   :  { %2570 = vrcp.f32 %v1643_v26 }
 0x2e4   :  { %v1641_v42 = vpop.xlane.xlu0 %1640 }
 0x2e5   :  { %2572 = vrcp.f32 %v1641_v42 }
 0x2e7   :  { %v2567_v44 = vpop.eup %2566 }
 0x2e8   :  { %v1767_v20 = vmul.f32 %v2567_v44, %v3343_v10  ;;  %v1647_v32 = vpop.xlane.xlu1 %1646  ;;  %v1645_v56 = vpop.xlane.xlu0 %1644 }
 0x2e9   :  { %2574 = vrcp.f32 %v1647_v32 }
 0x2ea   :  { %1893 = vst [vmem:[#allocation2 + $0x8] sm:$0xff] %v1767_v20  ;;  %2576 = vrcp.f32 %v1645_v56 }
 0x2eb   :  { %v2569_v30 = vpop.eup %2568 }
 0x2ec   :  { %v2571_v54 = vpop.eup %2570  ;;  %v1765_v46 = vmul.f32 %v2569_v30, %v3348_v58  ;;  %v1651_v24 = vpop.xlane.xlu1 %1650 }
 0x2ed   :  { %v1649_v34 = vpop.xlane.xlu0 %1648  ;;  %v1771_v48 = vmul.f32 %v2571_v54, %v3350_v60  ;;  %2578 = vrcp.f32 %v1651_v24 }
 0x2ee   :  { %1892 = vst [vmem:[#allocation2] sm:$0xff] %v1765_v46  ;;  %2580 = vrcp.f32 %v1649_v34 }
 0x2ef   :  { %v2573_v52 = vpop.eup %2572  ;;  %1895 = vst [vmem:[#allocation2 + $0x18] sm:$0xff] %v1771_v48 }
 0x2f0   :  { %v1769_v10 = vmul.f32 %v2573_v52, %v3356_v6  ;;  %v1655_v26 = vpop.xlane.xlu1 %1654 }
 0x2f1   :  { %v1653_v42 = vpop.xlane.xlu0 %1652  ;;  %2582 = vrcp.f32 %v1655_v26 }
 0x2f2   :  { %1894 = vst [vmem:[#allocation2 + $0x10] sm:$0xff] %v1769_v10  ;;  %2584 = vrcp.f32 %v1653_v42 }
 0x2f3   :  { %v2575_v56 = vpop.eup %2574 }
 0x2f4   :  { %v2577_v32 = vpop.eup %2576  ;;  %v1775_v58 = vmul.f32 %v2575_v56, %v3363_v9  ;;  %v1659_v30 = vpop.xlane.xlu1 %1658 }
 0x2f5   :  { %v1657_v20 = vpop.xlane.xlu0 %1656  ;;  %v1773_v60 = vmul.f32 %v2577_v32, %v3360_v2  ;;  %2586 = vrcp.f32 %v1659_v30 }
 0x2f6   :  { %1897 = vst [vmem:[#allocation2 + $0x28] sm:$0xff] %v1775_v58  ;;  %2588 = vrcp.f32 %v1657_v20 }
 0x2f7   :  { %v2579_v24 = vpop.eup %2578  ;;  %1896 = vst [vmem:[#allocation2 + $0x20] sm:$0xff] %v1773_v60 }
 0x2f8   :  { %v2581_v48 = vpop.eup %2580  ;;  %v1779_v6 = vmul.f32 %v2579_v24, %v3371_v57  ;;  %v1663_v46 = vpop.xlane.xlu1 %1662 }
 0x2f9   :  { %v1661_v54 = vpop.xlane.xlu0 %1660  ;;  %v1777_v44 = vmul.f32 %v2581_v48, %v3368_v17  ;;  %2590 = vrcp.f32 %v1663_v46 }
 0x2fa   :  { %1899 = vst [vmem:[#allocation2 + $0x38] sm:$0xff] %v1779_v6  ;;  %2592 = vrcp.f32 %v1661_v54 }
 0x2fb   :  { %v2583_v9 = vpop.eup %2582  ;;  %1898 = vst [vmem:[#allocation2 + $0x30] sm:$0xff] %v1777_v44 }
 0x2fc   :  { %v2585_v34 = vpop.eup %2584  ;;  %v1783_v2 = vmul.f32 %v2583_v9, %v3379_v13  ;;  %v1667_v52 = vpop.xlane.xlu1 %1666 }
 0x2fd   :  { %v1665_v10 = vpop.xlane.xlu0 %1664  ;;  %v1781_v26 = vmul.f32 %v2585_v34, %v3376_v19  ;;  %2594 = vrcp.f32 %v1667_v52 }
 0x2fe   :  { %1901 = vst [vmem:[#allocation2 + $0x48] sm:$0xff] %v1783_v2  ;;  %2596 = vrcp.f32 %v1665_v10 }
 0x2ff   :  { %v2587_v57 = vpop.eup %2586  ;;  %1900 = vst [vmem:[#allocation2 + $0x40] sm:$0xff] %v1781_v26 }
 0x300   :  { %v2589_v42 = vpop.eup %2588  ;;  %v1787_v17 = vmul.f32 %v2587_v57, %v3387_v15  ;;  %v1671_v56 = vpop.xlane.xlu1 %1670 }
 0x301   :  { %v1669_v32 = vpop.xlane.xlu0 %1668  ;;  %v1785_v58 = vmul.f32 %v2589_v42, %v3384_v21  ;;  %2598 = vrcp.f32 %v1671_v56 }
 0x302   :  { %1903 = vst [vmem:[#allocation2 + $0x58] sm:$0xff] %v1787_v17  ;;  %2600 = vrcp.f32 %v1669_v32 }
 0x303   :  { %v2591_v13 = vpop.eup %2590  ;;  %1902 = vst [vmem:[#allocation2 + $0x50] sm:$0xff] %v1785_v58 }
 0x304   :  { %v2593_v30 = vpop.eup %2592  ;;  %v1791_v19 = vmul.f32 %v2591_v13, %v3395_v12  ;;  %v1675_v20 = vpop.xlane.xlu1 %1674 }
 0x305   :  { %v1673_v60 = vpop.xlane.xlu0 %1672  ;;  %v1789_v24 = vmul.f32 %v2593_v30, %v3392_v23  ;;  %2602 = vrcp.f32 %v1675_v20 }
 0x306   :  { %1905 = vst [vmem:[#allocation2 + $0x68] sm:$0xff] %v1791_v19  ;;  %2604 = vrcp.f32 %v1673_v60 }
 0x307   :  { %v2595_v15 = vpop.eup %2594  ;;  %1904 = vst [vmem:[#allocation2 + $0x60] sm:$0xff] %v1789_v24 }
 0x308   :  { %v2597_v48 = vpop.eup %2596  ;;  %v1795_v21 = vmul.f32 %v2595_v15, %v3403_v5  ;;  %v1679_v6 = vpop.xlane.xlu1 %1678 }
 0x309   :  { %v1677_v46 = vpop.xlane.xlu0 %1676  ;;  %v1793_v54 = vmul.f32 %v2597_v48, %v3400_v25  ;;  %2606 = vrcp.f32 %v1679_v6 }
 0x30a   :  { %1907 = vst [vmem:[#allocation2 + $0x78] sm:$0xff] %v1795_v21  ;;  %2608 = vrcp.f32 %v1677_v46 }
 0x30b   :  { %v2599_v12 = vpop.eup %2598  ;;  %1906 = vst [vmem:[#allocation2 + $0x70] sm:$0xff] %v1793_v54 }
 0x30c   :  { %v2601_v44 = vpop.eup %2600  ;;  %v1799_v23 = vmul.f32 %v2599_v12, %v3411_v0  ;;  %v1683_v9 = vpop.xlane.xlu1 %1682 }
 0x30d   :  { %v1681_v34 = vpop.xlane.xlu0 %1680  ;;  %v1797_v2 = vmul.f32 %v2601_v44, %v3408_v27  ;;  %2610 = vrcp.f32 %v1683_v9 }
 0x30e   :  { %1909 = vst [vmem:[#allocation2 + $0x88] sm:$0xff] %v1799_v23  ;;  %2612 = vrcp.f32 %v1681_v34 }
 0x30f   :  { %v2603_v5 = vpop.eup %2602  ;;  %1908 = vst [vmem:[#allocation2 + $0x80] sm:$0xff] %v1797_v2 }
 0x310   :  { %v2605_v52 = vpop.eup %2604  ;;  %v1803_v25 = vmul.f32 %v2603_v5, %v3419_v4  ;;  %v1687_v10 = vpop.xlane.xlu1 %1686 }
 0x311   :  { %v1685_v26 = vpop.xlane.xlu0 %1684  ;;  %v1801_v57 = vmul.f32 %v2605_v52, %v3416_v29  ;;  %2614 = vrcp.f32 %v1687_v10 }
 0x312   :  { %1911 = vst [vmem:[#allocation2 + $0x98] sm:$0xff] %v1803_v25  ;;  %2616 = vrcp.f32 %v1685_v26 }
 0x313   :  { %v2607_v0 = vpop.eup %2606  ;;  %1910 = vst [vmem:[#allocation2 + $0x90] sm:$0xff] %v1801_v57 }
 0x314   :  { %v2609_v42 = vpop.eup %2608  ;;  %v1807_v27 = vmul.f32 %v2607_v0, %v3427_v3  ;;  %v1691_v17 = vpop.xlane.xlu1 %1690 }
 0x315   :  { %v1689_v56 = vpop.xlane.xlu0 %1688  ;;  %v1805_v32 = vmul.f32 %v2609_v42, %v3424_v31  ;;  %2618 = vrcp.f32 %v1691_v17 }
 0x316   :  { %1913 = vst [vmem:[#allocation2 + $0xa8] sm:$0xff] %v1807_v27  ;;  %2620 = vrcp.f32 %v1689_v56 }
 0x317   :  { %v2611_v4 = vpop.eup %2610  ;;  %1912 = vst [vmem:[#allocation2 + $0xa0] sm:$0xff] %v1805_v32 }
 0x318   :  { %v2613_v58 = vpop.eup %2612  ;;  %v1811_v29 = vmul.f32 %v2611_v4, %v3435_v63  ;;  %v1695_v13 = vpop.xlane.xlu1 %1694 }
 0x319   :  { %v1693_v30 = vpop.xlane.xlu0 %1692  ;;  %v1809_v19 = vmul.f32 %v2613_v58, %v3432_v33  ;;  %2622 = vrcp.f32 %v1695_v13 }
 0x31a   :  { %1915 = vst [vmem:[#allocation2 + $0xb8] sm:$0xff] %v1811_v29  ;;  %2624 = vrcp.f32 %v1693_v30 }
 0x31b   :  { %v2615_v3 = vpop.eup %2614  ;;  %1914 = vst [vmem:[#allocation2 + $0xb0] sm:$0xff] %v1809_v19 }
 0x31c   :  { %v2617_v20 = vpop.eup %2616  ;;  %v1815_v31 = vmul.f32 %v2615_v3, %v3443_v62  ;;  %v1699_v60 = vpop.xlane.xlu1 %1698 }
 0x31d   :  { %v1697_v24 = vpop.xlane.xlu0 %1696  ;;  %v1813_v15 = vmul.f32 %v2617_v20, %v3440_v35  ;;  %2626 = vrcp.f32 %v1699_v60 }
 0x31e   :  { %1917 = vst [vmem:[#allocation2 + $0xc8] sm:$0xff] %v1815_v31  ;;  %2628 = vrcp.f32 %v1697_v24 }
 0x31f   :  { %v2619_v63 = vpop.eup %2618  ;;  %1916 = vst [vmem:[#allocation2 + $0xc0] sm:$0xff] %v1813_v15 }
 0x320   :  { %v2621_v48 = vpop.eup %2620  ;;  %v1819_v33 = vmul.f32 %v2619_v63, %v3451_v1  ;;  %v1703_v21 = vpop.xlane.xlu1 %1702 }
 0x321   :  { %v1701_v6 = vpop.xlane.xlu0 %1700  ;;  %v1817_v46 = vmul.f32 %v2621_v48, %v3448_v37  ;;  %2630 = vrcp.f32 %v1703_v21 }
 0x322   :  { %1919 = vst [vmem:[#allocation2 + $0xd8] sm:$0xff] %v1819_v33  ;;  %2632 = vrcp.f32 %v1701_v6 }
 0x323   :  { %v2623_v62 = vpop.eup %2622  ;;  %1918 = vst [vmem:[#allocation2 + $0xd0] sm:$0xff] %v1817_v46 }
 0x324   :  { %v2625_v54 = vpop.eup %2624  ;;  %v1823_v35 = vmul.f32 %v2623_v62, %v3459_v8  ;;  %v1707_v12 = vpop.xlane.xlu1 %1706 }
 0x325   :  { %v1705_v44 = vpop.xlane.xlu0 %1704  ;;  %v1821_v23 = vmul.f32 %v2625_v54, %v3456_v39  ;;  %2634 = vrcp.f32 %v1707_v12 }
 0x326   :  { %1921 = vst [vmem:[#allocation2 + $0xe8] sm:$0xff] %v1823_v35  ;;  %2636 = vrcp.f32 %v1705_v44  ;;  %v3741_v35 = vld [vmem:[#allocation6_spill] sm:$0xff] }
 0x327   :  { %v2627_v1 = vpop.eup %2626  ;;  %1920 = vst [vmem:[#allocation2 + $0xe0] sm:$0xff] %v1821_v23  ;;  %v3742_v23 = vld [vmem:[#allocation8_spill] sm:$0xff] }
 0x328   :  { %v2629_v9 = vpop.eup %2628  ;;  %v1827_v37 = vmul.f32 %v2627_v1, %v3467_v59  ;;  %v1711_v34 = vpop.xlane.xlu1 %1710 }
 0x329   :  { %v1709_v2 = vpop.xlane.xlu0 %1708  ;;  %v1825_v5 = vmul.f32 %v2629_v9, %v3464_v41  ;;  %2638 = vrcp.f32 %v1711_v34 }
 0x32a   :  { %1923 = vst [vmem:[#allocation2 + $0xf8] sm:$0xff] %v1827_v37  ;;  %2640 = vrcp.f32 %v1709_v2  ;;  %v3743_v37 = vld [vmem:[#allocation5_spill] sm:$0xff] }
 0x32b   :  { %v2631_v8 = vpop.eup %2630  ;;  %1922 = vst [vmem:[#allocation2 + $0xf0] sm:$0xff] %v1825_v5  ;;  %v3744_v5 = vld [vmem:[#allocation10_spill] sm:$0xff] }
 0x32c   :  { %v2633_v52 = vpop.eup %2632  ;;  %v1831_v39 = vmul.f32 %v2631_v8, %v3475_v14  ;;  %v1715_v25 = vpop.xlane.xlu1 %1714 }
 0x32d   :  { %v1713_v10 = vpop.xlane.xlu0 %1712  ;;  %v1829_v26 = vmul.f32 %v2633_v52, %v3472_v43  ;;  %2642 = vrcp.f32 %v1715_v25  ;;  %v3745_v25 = vld [vmem:[#allocation7_spill] sm:$0xff] }
 0x32e   :  { %1925 = vst [vmem:[#allocation2 + $0x108] sm:$0xff] %v1831_v39  ;;  %2644 = vrcp.f32 %v1713_v10 }
 0x32f   :  { %v2635_v59 = vpop.eup %2634  ;;  %1924 = vst [vmem:[#allocation2 + $0x100] sm:$0xff] %v1829_v26 }
 0x330   :  { %v2637_v57 = vpop.eup %2636  ;;  %v1835_v41 = vmul.f32 %v2635_v59, %v3483_v7  ;;  %v1719_v0 = vpop.xlane.xlu1 %1718 }
 0x331   :  { %v1717_v42 = vpop.xlane.xlu0 %1716  ;;  %v1833_v27 = vmul.f32 %v2637_v57, %v3480_v45  ;;  %2646 = vrcp.f32 %v1719_v0 }
 0x332   :  { %1927 = vst [vmem:[#allocation2 + $0x118] sm:$0xff] %v1835_v41  ;;  %2648 = vrcp.f32 %v1717_v42 }
 0x333   :  { %v2639_v14 = vpop.eup %2638  ;;  %1926 = vst [vmem:[#allocation2 + $0x110] sm:$0xff] %v1833_v27 }
 0x334   :  { %v2641_v17 = vpop.eup %2640  ;;  %v1839_v43 = vmul.f32 %v2639_v14, %v3491_v18  ;;  %v1723_v56 = vpop.xlane.xlu1 %1722 }
 0x335   :  { %v1721_v32 = vpop.xlane.xlu0 %1720  ;;  %v1837_v4 = vmul.f32 %v2641_v17, %v3488_v47  ;;  %2650 = vrcp.f32 %v1723_v56 }
 0x336   :  { %1929 = vst [vmem:[#allocation2 + $0x128] sm:$0xff] %v1839_v43  ;;  %2652 = vrcp.f32 %v1721_v32 }
 0x337   :  { %v2643_v7 = vpop.eup %2642  ;;  %1928 = vst [vmem:[#allocation2 + $0x120] sm:$0xff] %v1837_v4 }
 0x338   :  { %v2645_v58 = vpop.eup %2644  ;;  %v1843_v45 = vmul.f32 %v2643_v7, %v3499_v11  ;;  %v1727_v29 = vpop.xlane.xlu1 %1726  ;;  %v3746_v7 = vld [vmem:[#allocation12_spill] sm:$0xff] }
 0x339   :  { %v1725_v13 = vpop.xlane.xlu0 %1724  ;;  %v1841_v30 = vmul.f32 %v2645_v58, %v3496_v49  ;;  %2654 = vrcp.f32 %v1727_v29  ;;  %v3747_v29 = vld [vmem:[#allocation9_spill] sm:$0xff] }
 0x33a   :  { %1931 = vst [vmem:[#allocation2 + $0x138] sm:$0xff] %v1843_v45  ;;  %2656 = vrcp.f32 %v1725_v13 }
 0x33b   :  { %v2647_v18 = vpop.eup %2646  ;;  %1930 = vst [vmem:[#allocation2 + $0x130] sm:$0xff] %v1841_v30 }
 0x33c   :  { %v2649_v19 = vpop.eup %2648  ;;  %v1847_v47 = vmul.f32 %v2647_v18, %v3507_v16  ;;  %v1731_v3 = vpop.xlane.xlu1 %1730  ;;  %v3748_v18 = vld [vmem:[#allocation14_spill] sm:$0xff] }
 0x33d   :  { %v1729_v20 = vpop.xlane.xlu0 %1728  ;;  %v1845_v31 = vmul.f32 %v2649_v19, %v3504_v51  ;;  %2658 = vrcp.f32 %v1731_v3  ;;  %v3749_v19 = vld [vmem:[#allocation11_spill] sm:$0xff] }
 0x33e   :  { %1933 = vst [vmem:[#allocation2 + $0x148] sm:$0xff] %v1847_v47  ;;  %2660 = vrcp.f32 %v1729_v20 }
 0x33f   :  { %v2651_v11 = vpop.eup %2650  ;;  %1932 = vst [vmem:[#allocation2 + $0x140] sm:$0xff] %v1845_v31  ;;  %v3750_v31 = vld [vmem:[#allocation16_spill] sm:$0xff] }
 0x340   :  { %v2653_v60 = vpop.eup %2652  ;;  %v1851_v49 = vmul.f32 %v2651_v11, %v3515_v50  ;;  %v1735_v24 = vpop.xlane.xlu1 %1734 }
 0x341   :  { %v1733_v15 = vpop.xlane.xlu0 %1732  ;;  %v1849_v63 = vmul.f32 %v2653_v60, %v3512_v53  ;;  %2662 = vrcp.f32 %v1735_v24  ;;  %v3751_v60 = vld [vmem:[#allocation13_spill] sm:$0xff] }
 0x342   :  { %1935 = vst [vmem:[#allocation2 + $0x158] sm:$0xff] %v1851_v49  ;;  %2664 = vrcp.f32 %v1733_v15 }
 0x343   :  { %v2655_v16 = vpop.eup %2654  ;;  %1934 = vst [vmem:[#allocation2 + $0x150] sm:$0xff] %v1849_v63  ;;  %v3752_v63 = vld [vmem:[#allocation18_spill] sm:$0xff] }
 0x344   :  { %v2657_v48 = vpop.eup %2656  ;;  %v1855_v51 = vmul.f32 %v2655_v16, %v3523_v40  ;;  %v1739_v33 = vpop.xlane.xlu1 %1738 }
 0x345   :  { %v1737_v21 = vpop.xlane.xlu0 %1736  ;;  %v1853_v6 = vmul.f32 %v2657_v48, %v3520_v55  ;;  %2666 = vrcp.f32 %v1739_v33  ;;  %v3753_v48 = vld [vmem:[#allocation15_spill] sm:$0xff] }
 0x346   :  { %1937 = vst [vmem:[#allocation2 + $0x168] sm:$0xff] %v1855_v51  ;;  %2668 = vrcp.f32 %v1737_v21 }
 0x347   :  { %v2659_v50 = vpop.eup %2658  ;;  %1936 = vst [vmem:[#allocation2 + $0x160] sm:$0xff] %v1853_v6 }
 0x348   :  { %v2661_v46 = vpop.eup %2660  ;;  %v1859_v53 = vmul.f32 %v2659_v50, %v3531_v61  ;;  %v1743_v62 = vpop.xlane.xlu1 %1742 }
 0x349   :  { %v1741_v54 = vpop.xlane.xlu0 %1740  ;;  %v1857_v12 = vmul.f32 %v2661_v46, %v3741_v35  ;;  %2670 = vrcp.f32 %v1743_v62 }
 0x34a   :  { %1939 = vst [vmem:[#allocation2 + $0x178] sm:$0xff] %v1859_v53  ;;  %2672 = vrcp.f32 %v1741_v54 }
 0x34b   :  { %v2663_v40 = vpop.eup %2662  ;;  %1938 = vst [vmem:[#allocation2 + $0x170] sm:$0xff] %v1857_v12 }
 0x34c   :  { %v2665_v44 = vpop.eup %2664  ;;  %v1863_v55 = vmul.f32 %v2663_v40, %v3742_v23  ;;  %v1747_v1 = vpop.xlane.xlu1 %1746 }
 0x34d   :  { %v1745_v9 = vpop.xlane.xlu0 %1744  ;;  %v1861_v34 = vmul.f32 %v2665_v44, %v3743_v37  ;;  %2674 = vrcp.f32 %v1747_v1 }
 0x34e   :  { %1941 = vst [vmem:[#allocation2 + $0x188] sm:$0xff] %v1863_v55  ;;  %2676 = vrcp.f32 %v1745_v9 }
 0x34f   :  { %v2667_v61 = vpop.eup %2666  ;;  %1940 = vst [vmem:[#allocation2 + $0x180] sm:$0xff] %v1861_v34 }
 0x350   :  { %v2669_v2 = vpop.eup %2668  ;;  %v1867_v8 = vmul.f32 %v2667_v61, %v3744_v5  ;;  %v1751_v52 = vpop.xlane.xlu1 %1750 }
 0x351   :  { %v1749_v39 = vpop.xlane.xlu0 %1748  ;;  %v1865_v10 = vmul.f32 %v2669_v2, %v3745_v25  ;;  %2678 = vrcp.f32 %v1751_v52 }
 0x352   :  { %1943 = vst [vmem:[#allocation2 + $0x198] sm:$0xff] %v1867_v8  ;;  %2680 = vrcp.f32 %v1749_v39 }
 0x353   :  { %v2671_v26 = vpop.eup %2670  ;;  %1942 = vst [vmem:[#allocation2 + $0x190] sm:$0xff] %v1865_v10 }
 0x354   :  { %v2673_v59 = vpop.eup %2672  ;;  %v1871_v57 = vmul.f32 %v2671_v26, %v3555_v22  ;;  %v1755_v41 = vpop.xlane.xlu1 %1754 }
 0x355   :  { %v1753_v0 = vpop.xlane.xlu0 %1752  ;;  %v1869_v42 = vmul.f32 %v2673_v59, %v3552_v28  ;;  %2682 = vrcp.f32 %v1755_v41 }
 0x356   :  { %1945 = vst [vmem:[#allocation2 + $0x1a8] sm:$0xff] %v1871_v57  ;;  %2684 = vrcp.f32 %v1753_v0 }
 0x357   :  { %v2675_v27 = vpop.eup %2674  ;;  %1944 = vst [vmem:[#allocation2 + $0x1a0] sm:$0xff] %v1869_v42 }
 0x358   :  { %v2677_v14 = vpop.eup %2676  ;;  %v1875_v17 = vmul.f32 %v2675_v27, %v3563_v36  ;;  %v1759_v43 = vpop.xlane.xlu1 %1758 }
 0x359   :  { %v1757_v56 = vpop.xlane.xlu0 %1756  ;;  %v1873_v32 = vmul.f32 %v2677_v14, %v3560_v38  ;;  %2686 = vrcp.f32 %v1759_v43 }
 0x35a   :  { %1947 = vst [vmem:[#allocation2 + $0x1b8] sm:$0xff] %v1875_v17  ;;  %2688 = vrcp.f32 %v1757_v56 }
 0x35b   :  { %v2679_v22 = vpop.eup %2678  ;;  %1946 = vst [vmem:[#allocation2 + $0x1b0] sm:$0xff] %v1873_v32 }
 0x35c   :  { %v2681_v4 = vpop.eup %2680  ;;  %v1879_v28 = vmul.f32 %v2679_v22, %v3746_v7  ;;  %v1763_v58 = vpop.xlane.xlu1 %1762 }
 0x35d   :  { %v1761_v45 = vpop.xlane.xlu0 %1760  ;;  %v1877_v13 = vmul.f32 %v2681_v4, %v3747_v29  ;;  %2690 = vrcp.f32 %v1763_v58 }
 0x35e   :  { %1949 = vst [vmem:[#allocation2 + $0x1c8] sm:$0xff] %v1879_v28  ;;  %2692 = vrcp.f32 %v1761_v45 }
 0x35f   :  { %v2683_v36 = vpop.eup %2682  ;;  %1948 = vst [vmem:[#allocation2 + $0x1c0] sm:$0xff] %v1877_v13 }
 0x360   :  { %v2685_v30 = vpop.eup %2684  ;;  %v1883_v38 = vmul.f32 %v2683_v36, %v3748_v18 }
 0x361   :  { %v1881_v47 = vmul.f32 %v2685_v30, %v3749_v19 }
 0x362   :  { %1951 = vst [vmem:[#allocation2 + $0x1d8] sm:$0xff] %v1883_v38 }
 0x363   :  { %v2687_v3 = vpop.eup %2686  ;;  %1950 = vst [vmem:[#allocation2 + $0x1d0] sm:$0xff] %v1881_v47 }
 0x364   :  { %v2689_v20 = vpop.eup %2688  ;;  %v1887_v11 = vmul.f32 %v2687_v3, %v3750_v31 }
 0x365   :  { %v1885_v49 = vmul.f32 %v2689_v20, %v3751_v60 }
 0x366   :  { %1953 = vst [vmem:[#allocation2 + $0x1e8] sm:$0xff] %v1887_v11 }
 0x367   :  { %v2691_v24 = vpop.eup %2690  ;;  %1952 = vst [vmem:[#allocation2 + $0x1e0] sm:$0xff] %v1885_v49 }
 0x368   :  { %v2693_v15 = vpop.eup %2692  ;;  %v1891_v16 = vmul.f32 %v2691_v24, %v3752_v63 }
 0x369   :  { %v1889_v51 = vmul.f32 %v2693_v15, %v3753_v48 }
 0x36a   :  { %1955 = vst [vmem:[#allocation2 + $0x1f8] sm:$0xff] %v1891_v16 }
 0x36b   :  { %1954 = vst [vmem:[#allocation2 + $0x1f0] sm:$0xff] %v1889_v51 }
 0x36c   :  { %2705 = shalt.err (!%p2702_p4)
}
 0x36d   :  { %s2706_s17 = scalar_lea.hbm %s3672_s4, 8192 }
 0x36e   :  { %p2707_p5 = scmp.ne.s32.totalorder %s3672_s4, %s2706_s17  ;;  %p2710_p6 = scmp.lt.u32.totalorder %s2706_s17, %s3672_s4 }
 0x370   :  { %p2712_p7 = pnand %p2710_p6, %p2707_p5 }
 0x372   :  { %2715 = shalt.err (!%p2712_p7)
}
 0x373   :  { %s2719_s22 = smov 128   ;;  %s2720_s1 = smov 8  }
 0x374   :  { %1967 = dma.vmem_to_hbm [thread:$0]  %s1962_s2, 8192, %s3672_s4, [#allocation3], %s2719_s22, %s2719_s22, %s2720_s1  }
 0x375   :  { %2716 = dma.done.wait [#allocation3], 8192  }
 0x376   :  { %2717 = vsyncadd [#allocation3], 4294959104 }
 0x377   :  { %1971 = vsyncpa [#allocation3], 1 }

</bundles_post_ra>
